<compile_context>
chip_gen: v6e
topology: v6e:2x2x1
jax: 0.10.0
libtpu: 0.0.40
codegen_flags: <defaults>
</compile_context>

<pallas_src>
import functools

import numpy as np
import jax
import jax.numpy as jnp
from jax import lax
from jax.experimental import pallas as pl
from jax.experimental.pallas import tpu as pltpu

_BN_EPS = 1e-5
_LEAKY_SLOPE = 0.01  # nn.LeakyReLU() default


def _round_up(x, m):
    return (x + m - 1) // m * m


def _pick_row_tile(M, cap):
    """Largest multiple of 8 <= cap dividing round_up(M, 8) -> avoids row padding."""
    M8 = _round_up(max(M, 1), 8)
    cap = max(8, min(cap, M8))
    best, t = 8, 8
    while t <= cap:
        if M8 % t == 0:
            best = t
        t += 8
    if best * 4 < cap:            # poor divisor structure: prefer big tiles + padding
        best = cap // 8 * 8
    return best


def _pick_lane_tile(N):
    if N % 128 == 0:
        return 256 if N % 256 == 0 else 128
    return N                      # full-dim lane block (legal, no padding)


def _pick_k_tile(K):
    if K % 128 == 0:
        for c in (512, 384, 256, 128):
            if K % c == 0:
                return c
    return K                      # full-dim K block (legal, no padding)


def _row_cap(C):
    """Row-tile cap so one f32 tile stays ~<=1.5 MiB (safe for v5e/v7x scoped VMEM)."""
    return max(8, min(1024, (384 * 1024 // max(C, 1)) // 8 * 8))


# --------------------------------------------------------------------------------------
# Pallas kernel 1: tiled MXU matmul with fused epilogue (bias, slope act, BN stats)
# --------------------------------------------------------------------------------------
def _mm_kernel(a_ref, b_ref, bias_ref, al_ref, *rest, act, with_stats):
    if with_stats:
        o_ref, s_ref, q_ref, acc_ref = rest
    else:
        o_ref, acc_ref = rest

    @pl.when(pl.program_id(2) == 0)
    def _init():
        acc_ref[...] = jnp.zeros_like(acc_ref)

    acc_ref[...] += jnp.dot(a_ref[...], b_ref[...],
                            preferred_element_type=jnp.float32)

    @pl.when(pl.program_id(2) == pl.num_programs(2) - 1)
    def _fin():
        acc = acc_ref[...]
        if with_stats:
            # Per-row-tile column sum / sum-of-squares of the (pre-BN) conv output,
            # stored in row 0 of an (8, tn) block (sublane-aligned), zeros elsewhere.
            row_ids = lax.broadcasted_iota(jnp.int32, s_ref.shape, 0)
            s_ref[...] = jnp.where(row_ids == 0,
                                   jnp.sum(acc, axis=0, keepdims=True), 0.0)
            q_ref[...] = jnp.where(row_ids == 0,
                                   jnp.sum(acc * acc, axis=0, keepdims=True), 0.0)
        y = acc + bias_ref[...]
        if act == "slope":
            y = jnp.where(y >= 0.0, y, y * al_ref[...])
        o_ref[...] = y.astype(o_ref.dtype)


def matmul(a, b, bias=None, slope=None, with_stats=False):
    """(M,K)@(K,N): bf16 operands, f32 accumulation.  Optional fused epilogue:
    + per-channel bias, per-channel slope activation (PReLU/LeakyReLU), and
    per-row-tile column sum / sum-of-squares (for train-mode BatchNorm stats)."""
    M, K = a.shape
    K2, N = b.shape
    assert K == K2
    if a.dtype != jnp.bfloat16:
        a = a.astype(jnp.bfloat16)
    if b.dtype != jnp.bfloat16:
        b = b.astype(jnp.bfloat16)

    tm = _pick_row_tile(M, 256)
    tn = _pick_lane_tile(N)
    tk = _pick_k_tile(K)
    Mp = _round_up(M, tm)
    if Mp != M:
        a = jnp.pad(a, ((0, Mp - M), (0, 0)))
    gm, gn, gk = Mp // tm, N // tn, K // tk

    bias_row = (jnp.zeros((1, N), jnp.float32) if bias is None
                else bias.astype(jnp.float32).reshape(1, N))
    slope_row = (jnp.zeros((1, N), jnp.float32) if slope is None
                 else slope.astype(jnp.float32).reshape(1, N))
    act = "none" if slope is None else "slope"

    out_shapes = [jax.ShapeDtypeStruct((Mp, N), jnp.float32)]
    out_specs = [pl.BlockSpec((tm, tn), lambda i, j, k: (i, j))]
    if with_stats:
        out_shapes += [jax.ShapeDtypeStruct((gm * 8, N), jnp.float32)] * 2
        out_specs += [pl.BlockSpec((8, tn), lambda i, j, k: (i, j))] * 2

    res = pl.pallas_call(
        functools.partial(_mm_kernel, act=act, with_stats=with_stats),
        out_shape=tuple(out_shapes),
        grid_spec=pltpu.PrefetchScalarGridSpec(
            num_scalar_prefetch=0,
            grid=(gm, gn, gk),
            in_specs=[
                pl.BlockSpec((tm, tk), lambda i, j, k: (i, k)),
                pl.BlockSpec((tk, tn), lambda i, j, k: (k, j)),
                pl.BlockSpec((1, tn), lambda i, j, k: (0, j)),
                pl.BlockSpec((1, tn), lambda i, j, k: (0, j)),
            ],
            out_specs=tuple(out_specs),
            scratch_shapes=[pltpu.VMEM((tm, tn), jnp.float32)],
        ),
        compiler_params=pltpu.CompilerParams(
            dimension_semantics=("parallel", "parallel", "arbitrary")),
    )(a, b, bias_row, slope_row)

    if with_stats:
        out, s, q = res
        if Mp != M:
            out = out[:M]
        return out, jnp.sum(s, axis=0), jnp.sum(q, axis=0)
    out = res[0] if isinstance(res, (tuple, list)) else res
    if Mp != M:
        out = out[:M]
    return out


# --------------------------------------------------------------------------------------
# Pallas kernel 2: per-channel sum / sum-of-squares (standalone BN batch stats)
# --------------------------------------------------------------------------------------
def _colstats_kernel(x_ref, s_ref, q_ref):
    @pl.when(pl.program_id(0) == 0)
    def _init():
        s_ref[...] = jnp.zeros_like(s_ref)
        q_ref[...] = jnp.zeros_like(q_ref)

    x = x_ref[...]
    s_ref[...] += jnp.sum(x, axis=0, keepdims=True)
    q_ref[...] += jnp.sum(x * x, axis=0, keepdims=True)


def column_stats(x2):
    """x2: (M, C) -> (sum over rows, sum of squares over rows), each (C,)."""
    M, C = x2.shape
    tm = _pick_row_tile(M, _row_cap(C))
    Mp = _round_up(M, tm)
    xp = x2.astype(jnp.float32)
    if Mp != M:
        xp = jnp.pad(xp, ((0, Mp - M), (0, 0)))
    s, q = pl.pallas_call(
        _colstats_kernel,
        out_shape=(jax.ShapeDtypeStruct((1, C), jnp.float32),
                   jax.ShapeDtypeStruct((1, C), jnp.float32)),
        grid_spec=pltpu.PrefetchScalarGridSpec(
            num_scalar_prefetch=0,
            grid=(Mp // tm,),
            in_specs=[pl.BlockSpec((tm, C), lambda i: (i, 0))],
            out_specs=(pl.BlockSpec((1, C), lambda i: (0, 0)),
                       pl.BlockSpec((1, C), lambda i: (0, 0))),
        ),
        compiler_params=pltpu.CompilerParams(dimension_semantics=("arbitrary",)),
    )(xp)
    return s[0], q[0]


# --------------------------------------------------------------------------------------
# Pallas kernel 3: fused per-channel affine + (PReLU / LeakyReLU) [+ residual add]
# --------------------------------------------------------------------------------------
def _affine_kernel(x_ref, sc_ref, sh_ref, al_ref, o_ref, *, act):
    y = x_ref[...] * sc_ref[...] + sh_ref[...]
    if act == "slope":
        y = jnp.where(y >= 0.0, y, y * al_ref[...])
    o_ref[...] = y


def _affine_res_kernel(x_ref, sc_ref, sh_ref, al_ref, r_ref, o_ref, *, act):
    y = x_ref[...] * sc_ref[...] + sh_ref[...]
    if act == "slope":
        y = jnp.where(y >= 0.0, y, y * al_ref[...])
    o_ref[...] = y + r_ref[...]


def affine_act(x2, scale, shift, alpha, act, residual=None):
    M, C = x2.shape
    tm = _pick_row_tile(M, _row_cap(C))
    Mp = _round_up(M, tm)
    x2 = x2.astype(jnp.float32)
    if Mp != M:
        x2 = jnp.pad(x2, ((0, Mp - M), (0, 0)))
    rows = [v.astype(jnp.float32).reshape(1, C) for v in (scale, shift, alpha)]
    args = [x2] + rows
    in_specs = ([pl.BlockSpec((tm, C), lambda i: (i, 0))] +
                [pl.BlockSpec((1, C), lambda i: (0, 0))] * 3)
    kern = _affine_kernel
    if residual is not None:
        r2 = residual.astype(jnp.float32)
        if Mp != M:
            r2 = jnp.pad(r2, ((0, Mp - M), (0, 0)))
        args.append(r2)
        in_specs.append(pl.BlockSpec((tm, C), lambda i: (i, 0)))
        kern = _affine_res_kernel
    out = pl.pallas_call(
        functools.partial(kern, act=act),
        out_shape=jax.ShapeDtypeStruct((Mp, C), jnp.float32),
        grid_spec=pltpu.PrefetchScalarGridSpec(
            num_scalar_prefetch=0,
            grid=(Mp // tm,),
            in_specs=in_specs,
            out_specs=pl.BlockSpec((tm, C), lambda i: (i, 0)),
        ),
        compiler_params=pltpu.CompilerParams(dimension_semantics=("parallel",)),
    )(*args)
    return out[:M] if Mp != M else out


# --------------------------------------------------------------------------------------
# Mid-level (jitted) ops built on the kernels
# --------------------------------------------------------------------------------------
def _im2col(x, kh, kw, stride, padding):
    """Build (N*Ho*Wo, kh*kw*Cin) bf16 patches (bf16 halves patch HBM traffic).
    TODO(synk): fold the kh*kw taps into the matmul K grid via the A BlockSpec
    index_map over the padded NHWC activation to avoid materializing this at all."""
    N, H, W, Cin = x.shape
    Ho = (H + 2 * padding - kh) // stride + 1
    Wo = (W + 2 * padding - kw) // stride + 1
    xp = x.astype(jnp.bfloat16)
    if padding:
        xp = jnp.pad(xp, ((0, 0), (padding, padding), (padding, padding), (0, 0)))
    if kh == 1 and kw == 1:
        patches = xp[:, ::stride, ::stride, :].reshape(N * Ho * Wo, Cin)
    else:
        cols = []
        for di in range(kh):
            for dj in range(kw):
                cols.append(xp[:, di:di + (Ho - 1) * stride + 1:stride,
                                  dj:dj + (Wo - 1) * stride + 1:stride, :])
        patches = jnp.concatenate(cols, axis=-1).reshape(N * Ho * Wo, kh * kw * Cin)
    return patches, N, Ho, Wo


@functools.partial(jax.jit, static_argnames=("stride", "padding"))
def conv_bn_act(x, w, gamma, beta, slope, residual, *, stride, padding):
    """Conv2d(bias=False) -> train-mode BatchNorm2d (stats fused into the matmul
    epilogue) -> optional slope activation -> optional residual add.  NHWC in/out."""
    kh, kw, _, Cout = w.shape
    patches, N, Ho, Wo = _im2col(x, kh, kw, stride, padding)
    out2, s, q = matmul(patches, w.reshape(-1, Cout), with_stats=True)
    m = float(N * Ho * Wo)
    mean = s / m
    var = jnp.maximum(q / m - mean * mean, 0.0)
    scale = gamma * lax.rsqrt(var + _BN_EPS)
    shift = beta - mean * scale
    act = "none" if slope is None else "slope"
    alpha = jnp.zeros((Cout,), jnp.float32) if slope is None else slope
    res2 = None if residual is None else residual.reshape(-1, Cout)
    y2 = affine_act(out2, scale, shift, alpha, act, residual=res2)
    return y2.reshape(N, Ho, Wo, Cout)


@functools.partial(jax.jit, static_argnames=("stride", "padding"))
def conv_act(x, w, bias, slope, *, stride, padding):
    """Conv2d with optional bias and slope activation fused into the matmul epilogue."""
    kh, kw, _, Cout = w.shape
    patches, N, Ho, Wo = _im2col(x, kh, kw, stride, padding)
    out2 = matmul(patches, w.reshape(-1, Cout), bias=bias, slope=slope)
    return out2.reshape(N, Ho, Wo, Cout)


@jax.jit
def batchnorm_only(x, gamma, beta):
    """Standalone train-mode BatchNorm2d (the bottleneck's leading BN)."""
    N, H, W, C = x.shape
    x2 = x.reshape(-1, C)
    s, q = column_stats(x2)
    m = float(N * H * W)
    mean = s / m
    var = jnp.maximum(q / m - mean * mean, 0.0)
    scale = gamma * lax.rsqrt(var + _BN_EPS)
    shift = beta - mean * scale
    y2 = affine_act(x2, scale, shift, jnp.zeros((C,), jnp.float32), "none")
    return y2.reshape(x.shape)


@jax.jit
def tensor_add(x, r):
    """Elementwise add of two NHWC tensors (FPN upsample-add)."""
    C = x.shape[-1]
    ones = jnp.ones((C,), jnp.float32)
    zeros = jnp.zeros((C,), jnp.float32)
    y2 = affine_act(x.reshape(-1, C), ones, zeros, zeros, "none",
                    residual=r.reshape(-1, C))
    return y2.reshape(x.shape)


@jax.jit
def linear_fwd(x2, w, b):
    return matmul(x2, w, bias=b)


def _interp_matrix(out_size, in_size):
    A = np.zeros((out_size, in_size), np.float32)
    if in_size == 1 or out_size == 1:
        A[:, 0] = 1.0
        return A
    scale = (in_size - 1) / (out_size - 1)
    for i in range(out_size):
        src = i * scale
        lo = int(np.floor(src))
        hi = min(lo + 1, in_size - 1)
        w = src - lo
        A[i, lo] += 1.0 - w
        A[i, hi] += w
    return A


@functools.partial(jax.jit, static_argnames=("h_out", "w_out"))
def bilinear_resize(x, *, h_out, w_out):
    """Bilinear, align_corners=True, as two separable Pallas matmuls (small, unpadded K)."""
    N, H, W, C = x.shape
    Ah = jnp.asarray(_interp_matrix(h_out, H))
    Aw = jnp.asarray(_interp_matrix(w_out, W))
    xr = jnp.transpose(x, (1, 0, 2, 3)).reshape(H, N * W * C)
    y = matmul(Ah, xr).reshape(h_out, N, W, C)
    yr = jnp.transpose(y, (2, 1, 0, 3)).reshape(W, N * h_out * C)
    z = matmul(Aw, yr).reshape(w_out, N, h_out, C)
    return jnp.transpose(z, (1, 2, 0, 3))                   # (N, h_out, w_out, C)


# --------------------------------------------------------------------------------------
# Parameter construction (deterministic, kaiming_normal_ like initialize_network)
# --------------------------------------------------------------------------------------
class ParamGen:
    def __init__(self, seed=0):
        self.key = jax.random.PRNGKey(seed)

    def _next(self):
        self.key, k = jax.random.split(self.key)
        return k

    def conv_w(self, kh, kw, cin, cout):
        fan_in = kh * kw * cin
        std = float(np.sqrt(2.0 / fan_in))          # kaiming_normal_(a=0), fan_in
        return jax.random.normal(self._next(), (kh, kw, cin, cout), jnp.float32) * std

    def bias(self, cout, fan_in):
        b = 1.0 / float(np.sqrt(fan_in))
        return jax.random.uniform(self._next(), (cout,), jnp.float32, -b, b)

    def linear(self, cin, cout):
        std = float(np.sqrt(2.0 / cin))
        w = jax.random.normal(self._next(), (cin, cout), jnp.float32) * std
        return w, self.bias(cout, cin)

    def bn(self, c):
        return jnp.ones((c,), jnp.float32), jnp.zeros((c,), jnp.float32)

    def prelu(self, c):
        return jnp.full((c,), 0.25, jnp.float32)    # nn.PReLU default init


def get_blocks(num_layers):
    cfg = {
        50: [(64, 64, 3), (64, 128, 4), (128, 256, 14), (256, 512, 3)],
        100: [(64, 64, 3), (64, 128, 13), (128, 256, 30), (256, 512, 3)],
        152: [(64, 64, 3), (64, 128, 8), (128, 256, 36), (256, 512, 3)],
    }[num_layers]
    blocks = []
    for in_c, depth, n in cfg:
        blocks.append([(in_c, depth, 2)] + [(depth, depth, 1)] * (n - 1))
    return blocks


def make_bottleneck_params(pg, in_c, depth, stride):
    p = {"in_c": in_c, "depth": depth, "stride": stride}
    if in_c != depth:                       # shortcut = Conv1x1 (no bias) + BN
        p["short_w"] = pg.conv_w(1, 1, in_c, depth)
        p["short_bn"] = pg.bn(depth)
    p["bn1"] = pg.bn(in_c)
    p["conv1_w"] = pg.conv_w(3, 3, in_c, depth)
    p["prelu"] = pg.prelu(depth)
    p["conv2_w"] = pg.conv_w(3, 3, depth, depth)
    p["bn2"] = pg.bn(depth)
    return p


def make_style_params(pg, in_c, out_c, resolution):
    n_convs = int(np.log2(resolution))
    convs = []
    for _ in range(n_convs):
        convs.append({"w": pg.conv_w(3, 3, in_c, out_c), "bn": pg.bn(out_c)})
        # Conv2d bias omitted: a train-mode BatchNorm follows immediately, which
        # cancels any per-channel constant shift exactly, so the output is identical.
    lw, lb = pg.linear(out_c, out_c)
    return {"convs": convs, "lin_w": lw, "lin_b": lb}


def make_psp_params(pg, in_channels=3, num_layers=50, n_styles=16, input_resolution=32):
    params = {
        "input_conv_w": pg.conv_w(3, 3, in_channels, 64),
        "input_bn": pg.bn(64),
        "input_prelu": pg.prelu(64),
    }
    body = []
    for block in get_blocks(num_layers):
        for in_c, depth, stride in block:
            body.append(make_bottleneck_params(pg, in_c, depth, stride))
    params["body"] = body
    styles = []
    for i in range(n_styles):
        if i < 3:
            res = input_resolution // 2 ** 5
        elif i < 7:
            res = input_resolution // 2 ** 4
        else:
            res = input_resolution // 2 ** 3
        styles.append(make_style_params(pg, 512, 512, res))
    params["styles"] = styles
    params["lat1_w"] = pg.conv_w(1, 1, 256, 512)
    params["lat1_b"] = pg.bias(512, 256)
    params["lat2_w"] = pg.conv_w(1, 1, 128, 512)
    params["lat2_b"] = pg.bias(512, 128)
    return params


# --------------------------------------------------------------------------------------
# Forward pass (mirrors PSPEncoder.forward, mode='ir')
# --------------------------------------------------------------------------------------
def bottleneck_forward(p, x):
    stride = p["stride"]
    if "short_w" in p:
        sc = conv_bn_act(x, p["short_w"], p["short_bn"][0], p["short_bn"][1],
                         None, None, stride=stride, padding=0)
    else:
        # shortcut = MaxPool2d(kernel_size=1, stride=stride) -> strided subsample (glue)
        sc = x if stride == 1 else x[:, ::stride, ::stride, :]
    r = batchnorm_only(x, p["bn1"][0], p["bn1"][1])
    # conv1 + PReLU fused into the matmul epilogue (no BN in between)
    r = conv_act(r, p["conv1_w"], None, p["prelu"], stride=1, padding=1)
    # conv2 + BN(+stats fused) + residual shortcut add
    return conv_bn_act(r, p["conv2_w"], p["bn2"][0], p["bn2"][1],
                       None, sc, stride=stride, padding=1)


def style_group_forward(style_list, x):
    """Run a group of GradualStyleBlocks that share the same input feature map.
    Their first conv is batched along Cout so the shared im2col patches are read once."""
    outs = []
    n_convs = len(style_list[0]["convs"])
    if n_convs > 0:
        cout = style_list[0]["convs"][0]["w"].shape[-1]
        w_cat = jnp.concatenate([p["convs"][0]["w"] for p in style_list], axis=-1)
        g_cat = jnp.concatenate([p["convs"][0]["bn"][0] for p in style_list])
        b_cat = jnp.concatenate([p["convs"][0]["bn"][1] for p in style_list])
        ctot = w_cat.shape[-1]
        y = conv_bn_act(x, w_cat, g_cat, b_cat,
                        jnp.full((ctot,), _LEAKY_SLOPE, jnp.float32), None,
                        stride=2, padding=1)
        xs = [y[..., g * cout:(g + 1) * cout] for g in range(len(style_list))]
    else:
        xs = [x] * len(style_list)
    for p, xg in zip(style_list, xs):
        for cp in p["convs"][1:]:
            co = cp["w"].shape[-1]
            xg = conv_bn_act(xg, cp["w"], cp["bn"][0], cp["bn"][1],
                             jnp.full((co,), _LEAKY_SLOPE, jnp.float32), None,
                             stride=2, padding=1)
        # MaxPool2d(2): spatial here is exactly 2x2 -> 1x1 (tiny reduction, JAX glue)
        N, H, W, C = xg.shape
        v = xg.reshape(N, H // 2, 2, W // 2, 2, C).max(axis=(2, 4)).reshape(N, C)
        outs.append(linear_fwd(v, p["lin_w"], p["lin_b"]))
    return outs


def psp_forward(params, x_nchw, n_styles=16, coarse_ind=3, middle_ind=7):
    # layout: public input is NCHW (PyTorch convention); NHWC internally.
    x = jnp.transpose(x_nchw, (0, 2, 3, 1)).astype(jnp.float32)

    # input layer: Conv3x3(no bias) -> BN -> PReLU(64)   (BN stats + affine + PReLU fused)
    x = conv_bn_act(x, params["input_conv_w"], params["input_bn"][0],
                    params["input_bn"][1], params["input_prelu"], None,
                    stride=1, padding=1)

    skips = []
    for bp in params["body"]:
        x = bottleneck_forward(bp, x)
        skips.append(x)
    c1, c2, c3 = skips[6], skips[20], skips[23]

    latents = []
    latents += style_group_forward(params["styles"][:coarse_ind], c3)

    # p2 = upsample(c3 -> c2 size, bilinear align_corners) + latlayer1(c2) (bias fused)
    lat2 = conv_act(c2, params["lat1_w"], params["lat1_b"], None, stride=1, padding=0)
    up3 = bilinear_resize(c3, h_out=c2.shape[1], w_out=c2.shape[2])
    p2 = tensor_add(lat2, up3)
    latents += style_group_forward(params["styles"][coarse_ind:middle_ind], p2)

    # p1 = upsample(p2 -> c1 size) + latlayer2(c1) (bias fused)
    lat1 = conv_act(c1, params["lat2_w"], params["lat2_b"], None, stride=1, padding=0)
    up2 = bilinear_resize(p2, h_out=c1.shape[1], w_out=c1.shape[2])
    p1 = tensor_add(lat1, up2)
    latents += style_group_forward(params["styles"][middle_ind:], p1)

    return jnp.stack(latents, axis=1)   # (N, n_styles, 512)


# --------------------------------------------------------------------------------------
if __name__ == "__main__":
    INPUT_RES = 32          # small, but consistent with the module
    BATCH = 2
    N_STYLES = 16

    pg = ParamGen(seed=0)   # deterministic params from jax.random.PRNGKey(0)
    params = make_psp_params(pg, in_channels=3, num_layers=50,
                             n_styles=N_STYLES, input_resolution=INPUT_RES)

    x = jax.random.normal(jax.random.PRNGKey(0), (BATCH, 3, INPUT_RES, INPUT_RES),
                          jnp.float32)

    out = psp_forward(params, x, n_styles=N_STYLES)
    out = jax.block_until_ready(out)

    assert out.shape == (BATCH, N_STYLES, 512), out.shape
    assert bool(jnp.all(jnp.isfinite(out)))
    print("KERNEL_OK")
</pallas_src>

<mosaic_0001>
module attributes {stable_mosaic.version = 11 : i64} {
  func.func @_mm_kernel(%arg0: i32, %arg1: i32, %arg2: i32, %arg3: memref<256x27xbf16, #tpu.memory_space<vmem>>, %arg4: memref<27x64xbf16, #tpu.memory_space<vmem>>, %arg5: memref<1x64xf32, #tpu.memory_space<vmem>>, %arg6: memref<1x64xf32, #tpu.memory_space<vmem>>, %arg7: memref<256x64xf32, #tpu.memory_space<vmem>>, %arg8: memref<8x64xf32, #tpu.memory_space<vmem>>, %arg9: memref<8x64xf32, #tpu.memory_space<vmem>>, %arg10: memref<256x64xf32, #tpu.memory_space<vmem>>) attributes {dimension_semantics = [#tpu.dimension_semantics<parallel>, #tpu.dimension_semantics<parallel>, #tpu.dimension_semantics<arbitrary>], iteration_bounds = array<i64: 8, 1, 1>, scalar_prefetch = 0 : i64, scratch_operands = 1 : i64, tpu.core_type = #tpu.core_type<tc>, window_params = [{transform_indices = @transform_0, window_bounds = array<i64: 256, 27>}, {transform_indices = @transform_1, window_bounds = array<i64: 27, 64>}, {transform_indices = @transform_2, window_bounds = array<i64: 1, 64>}, {transform_indices = @transform_3, window_bounds = array<i64: 1, 64>}, {transform_indices = @transform_4, window_bounds = array<i64: 256, 64>}, {transform_indices = @transform_5, window_bounds = array<i64: 8, 64>}, {transform_indices = @transform_6, window_bounds = array<i64: 8, 64>}]} {
    %c0_i32 = arith.constant 0 : i32
    %0 = arith.cmpi eq, %arg2, %c0_i32 : i32
    %1 = arith.extui %0 : i1 to i32
    %c0_i32_0 = arith.constant 0 : i32
    %2 = arith.cmpi ne, %1, %c0_i32_0 : i32
    scf.if %2 {
      %cst_10 = arith.constant 0.000000e+00 : f32
      %12 = vector.broadcast %cst_10 : f32 to vector<256x64xf32>
      %c0_11 = arith.constant 0 : index
      %c0_12 = arith.constant 0 : index
      %13 = vector.load %arg10[%c0_11, %c0_12] : memref<256x64xf32, #tpu.memory_space<vmem>>, vector<256x64xf32>
      tpu.vector_store %arg10[%c0_11, %c0_12], %12 {strides = array<i32>} : memref<256x64xf32, #tpu.memory_space<vmem>>, vector<256x64xf32>,
    } else {
    }
    %c0 = arith.constant 0 : index
    %c0_1 = arith.constant 0 : index
    %3 = vector.load %arg10[%c0, %c0_1] : memref<256x64xf32, #tpu.memory_space<vmem>>, vector<256x64xf32>
    %c0_2 = arith.constant 0 : index
    %c0_3 = arith.constant 0 : index
    %4 = vector.load %arg3[%c0_2, %c0_3] : memref<256x27xbf16, #tpu.memory_space<vmem>>, vector<256x27xbf16>
    %c0_4 = arith.constant 0 : index
    %c0_5 = arith.constant 0 : index
    %5 = vector.load %arg4[%c0_4, %c0_5] : memref<27x64xbf16, #tpu.memory_space<vmem>>, vector<27x64xbf16>
    %cst = arith.constant dense<0.000000e+00> : vector<256x64xf32>
    %6 = tpu.matmul %4, %5, %cst {dimension_numbers = #tpu.dot_dimension_numbers<[1], [0], [0], [1], [0, 0, 1, 1], [], []>} : vector<256x27xbf16>, vector<27x64xbf16>, vector<256x64xf32> -> vector<256x64xf32>
    %7 = arith.addf %3, %6 : vector<256x64xf32>
    %c0_6 = arith.constant 0 : index
    %c0_7 = arith.constant 0 : index
    %8 = vector.load %arg10[%c0_6, %c0_7] : memref<256x64xf32, #tpu.memory_space<vmem>>, vector<256x64xf32>
    tpu.vector_store %arg10[%c0_6, %c0_7], %7 {strides = array<i32>} : memref<256x64xf32, #tpu.memory_space<vmem>>, vector<256x64xf32>,
    %c0_i32_8 = arith.constant 0 : i32
    %9 = arith.cmpi eq, %arg2, %c0_i32_8 : i32
    %10 = arith.extui %9 : i1 to i32
    %c0_i32_9 = arith.constant 0 : i32
    %11 = arith.cmpi ne, %10, %c0_i32_9 : i32
    scf.if %11 {
      %c0_10 = arith.constant 0 : index
      %c0_11 = arith.constant 0 : index
      %12 = vector.load %arg10[%c0_10, %c0_11] : memref<256x64xf32, #tpu.memory_space<vmem>>, vector<256x64xf32>
      %13 = tpu.iota {dimensions = array<i32: 0>} : vector<8x64xi32>
      %c0_i32_12 = arith.constant 0 : i32
      %14 = vector.broadcast %c0_i32_12 : i32 to vector<8x64xi32>
      %15 = arith.cmpi eq, %13, %14 : vector<8x64xi32>
      %cst_13 = arith.constant dense<0.000000e+00> : vector<64xf32>
      %16 = vector.multi_reduction <add>, %12, %cst_13 [0] : vector<256x64xf32> to vector<64xf32>
      %17 = vector.shape_cast %16 : vector<64xf32> to vector<1x64xf32>
      %cst_14 = arith.constant 0.000000e+00 : f32
      %18 = vector.shape_cast %17 : vector<1x64xf32> to vector<1x64xf32>
      %19 = vector.broadcast %18 : vector<1x64xf32> to vector<8x64xf32>
      %20 = vector.broadcast %cst_14 : f32 to vector<8x64xf32>
      %21 = arith.select %15, %19, %20 : vector<8x64xi1>, vector<8x64xf32>
      %c0_15 = arith.constant 0 : index
      %c0_16 = arith.constant 0 : index
      %22 = vector.load %arg8[%c0_15, %c0_16] : memref<8x64xf32, #tpu.memory_space<vmem>>, vector<8x64xf32>
      tpu.vector_store %arg8[%c0_15, %c0_16], %21 {strides = array<i32>} : memref<8x64xf32, #tpu.memory_space<vmem>>, vector<8x64xf32>,
      %c0_i32_17 = arith.constant 0 : i32
      %23 = vector.broadcast %c0_i32_17 : i32 to vector<8x64xi32>
      %24 = arith.cmpi eq, %13, %23 : vector<8x64xi32>
      %25 = arith.mulf %12, %12 : vector<256x64xf32>
      %cst_18 = arith.constant dense<0.000000e+00> : vector<64xf32>
      %26 = vector.multi_reduction <add>, %25, %cst_18 [0] : vector<256x64xf32> to vector<64xf32>
      %27 = vector.shape_cast %26 : vector<64xf32> to vector<1x64xf32>
      %cst_19 = arith.constant 0.000000e+00 : f32
      %28 = vector.shape_cast %27 : vector<1x64xf32> to vector<1x64xf32>
      %29 = vector.broadcast %28 : vector<1x64xf32> to vector<8x64xf32>
      %30 = vector.broadcast %cst_19 : f32 to vector<8x64xf32>
      %31 = arith.select %24, %29, %30 : vector<8x64xi1>, vector<8x64xf32>
      %c0_20 = arith.constant 0 : index
      %c0_21 = arith.constant 0 : index
      %32 = vector.load %arg9[%c0_20, %c0_21] : memref<8x64xf32, #tpu.memory_space<vmem>>, vector<8x64xf32>
      tpu.vector_store %arg9[%c0_20, %c0_21], %31 {strides = array<i32>} : memref<8x64xf32, #tpu.memory_space<vmem>>, vector<8x64xf32>,
      %c0_22 = arith.constant 0 : index
      %c0_23 = arith.constant 0 : index
      %33 = vector.load %arg5[%c0_22, %c0_23] : memref<1x64xf32, #tpu.memory_space<vmem>>, vector<1x64xf32>
      %34 = vector.broadcast %33 : vector<1x64xf32> to vector<256x64xf32>
      %35 = arith.addf %12, %34 : vector<256x64xf32>
      %c0_24 = arith.constant 0 : index
      %c0_25 = arith.constant 0 : index
      %36 = vector.load %arg7[%c0_24, %c0_25] : memref<256x64xf32, #tpu.memory_space<vmem>>, vector<256x64xf32>
      tpu.vector_store %arg7[%c0_24, %c0_25], %35 {strides = array<i32>} : memref<256x64xf32, #tpu.memory_space<vmem>>, vector<256x64xf32>,
    } else {
    }
    return
  }
  func.func @transform_0(%arg0: i32, %arg1: i32, %arg2: i32) -> (i32, i32) {
    %c0_i32 = arith.constant 0 : i32
    return %arg0, %arg2 : i32, i32
  }
  func.func @transform_1(%arg0: i32, %arg1: i32, %arg2: i32) -> (i32, i32) {
    %c0_i32 = arith.constant 0 : i32
    return %arg2, %arg1 : i32, i32
  }
  func.func @transform_2(%arg0: i32, %arg1: i32, %arg2: i32) -> (i32, i32) {
    %c0_i32 = arith.constant 0 : i32
    %c0_i32_0 = arith.constant 0 : i32
    return %c0_i32, %arg1 : i32, i32
  }
  func.func @transform_3(%arg0: i32, %arg1: i32, %arg2: i32) -> (i32, i32) {
    %c0_i32 = arith.constant 0 : i32
    %c0_i32_0 = arith.constant 0 : i32
    return %c0_i32, %arg1 : i32, i32
  }
  func.func @transform_4(%arg0: i32, %arg1: i32, %arg2: i32) -> (i32, i32) {
    %c0_i32 = arith.constant 0 : i32
    return %arg0, %arg1 : i32, i32
  }
  func.func @transform_5(%arg0: i32, %arg1: i32, %arg2: i32) -> (i32, i32) {
    %c0_i32 = arith.constant 0 : i32
    return %arg0, %arg1 : i32, i32
  }
  func.func @transform_6(%arg0: i32, %arg1: i32, %arg2: i32) -> (i32, i32) {
    %c0_i32 = arith.constant 0 : i32
    return %arg0, %arg1 : i32, i32
  }
}

module attributes {stable_mosaic.version = 11 : i64} {
  func.func @_affine_kernel(%arg0: i32, %arg1: memref<1024x64xf32, #tpu.memory_space<vmem>>, %arg2: memref<1x64xf32, #tpu.memory_space<vmem>>, %arg3: memref<1x64xf32, #tpu.memory_space<vmem>>, %arg4: memref<1x64xf32, #tpu.memory_space<vmem>>, %arg5: memref<1024x64xf32, #tpu.memory_space<vmem>>) attributes {dimension_semantics = [#tpu.dimension_semantics<parallel>], iteration_bounds = array<i64: 2>, scalar_prefetch = 0 : i64, scratch_operands = 0 : i64, tpu.core_type = #tpu.core_type<tc>, window_params = [{transform_indices = @transform_0, window_bounds = array<i64: 1024, 64>}, {pipeline_mode = #tpu.pipeline_mode<synchronous>, transform_indices = @transform_1, window_bounds = array<i64: 1, 64>}, {pipeline_mode = #tpu.pipeline_mode<synchronous>, transform_indices = @transform_2, window_bounds = array<i64: 1, 64>}, {pipeline_mode = #tpu.pipeline_mode<synchronous>, transform_indices = @transform_3, window_bounds = array<i64: 1, 64>}, {transform_indices = @transform_4, window_bounds = array<i64: 1024, 64>}]} {
    %c0 = arith.constant 0 : index
    %c0_0 = arith.constant 0 : index
    %0 = vector.load %arg1[%c0, %c0_0] : memref<1024x64xf32, #tpu.memory_space<vmem>>, vector<1024x64xf32>
    %c0_1 = arith.constant 0 : index
    %c0_2 = arith.constant 0 : index
    %1 = vector.load %arg2[%c0_1, %c0_2] : memref<1x64xf32, #tpu.memory_space<vmem>>, vector<1x64xf32>
    %2 = vector.broadcast %1 : vector<1x64xf32> to vector<1024x64xf32>
    %3 = arith.mulf %0, %2 : vector<1024x64xf32>
    %c0_3 = arith.constant 0 : index
    %c0_4 = arith.constant 0 : index
    %4 = vector.load %arg3[%c0_3, %c0_4] : memref<1x64xf32, #tpu.memory_space<vmem>>, vector<1x64xf32>
    %5 = vector.broadcast %4 : vector<1x64xf32> to vector<1024x64xf32>
    %6 = arith.addf %3, %5 : vector<1024x64xf32>
    %cst = arith.constant 0.000000e+00 : f32
    %7 = vector.broadcast %cst : f32 to vector<1024x64xf32>
    %8 = arith.cmpf oge, %6, %7 : vector<1024x64xf32>
    %c0_5 = arith.constant 0 : index
    %c0_6 = arith.constant 0 : index
    %9 = vector.load %arg4[%c0_5, %c0_6] : memref<1x64xf32, #tpu.memory_space<vmem>>, vector<1x64xf32>
    %10 = vector.broadcast %9 : vector<1x64xf32> to vector<1024x64xf32>
    %11 = arith.mulf %6, %10 : vector<1024x64xf32>
    %12 = arith.select %8, %6, %11 : vector<1024x64xi1>, vector<1024x64xf32>
    %c0_7 = arith.constant 0 : index
    %c0_8 = arith.constant 0 : index
    %13 = vector.load %arg5[%c0_7, %c0_8] : memref<1024x64xf32, #tpu.memory_space<vmem>>, vector<1024x64xf32>
    tpu.vector_store %arg5[%c0_7, %c0_8], %12 {strides = array<i32>} : memref<1024x64xf32, #tpu.memory_space<vmem>>, vector<1024x64xf32>,
    return
  }
  func.func @transform_0(%arg0: i32) -> (i32, i32) {
    %c0_i32 = arith.constant 0 : i32
    %c0_i32_0 = arith.constant 0 : i32
    return %arg0, %c0_i32 : i32, i32
  }
  func.func @transform_1(%arg0: i32) -> (i32, i32) {
    %c0_i32 = arith.constant 0 : i32
    %c0_i32_0 = arith.constant 0 : i32
    %c0_i32_1 = arith.constant 0 : i32
    return %c0_i32, %c0_i32_0 : i32, i32
  }
  func.func @transform_2(%arg0: i32) -> (i32, i32) {
    %c0_i32 = arith.constant 0 : i32
    %c0_i32_0 = arith.constant 0 : i32
    %c0_i32_1 = arith.constant 0 : i32
    return %c0_i32, %c0_i32_0 : i32, i32
  }
  func.func @transform_3(%arg0: i32) -> (i32, i32) {
    %c0_i32 = arith.constant 0 : i32
    %c0_i32_0 = arith.constant 0 : i32
    %c0_i32_1 = arith.constant 0 : i32
    return %c0_i32, %c0_i32_0 : i32, i32
  }
  func.func @transform_4(%arg0: i32) -> (i32, i32) {
    %c0_i32 = arith.constant 0 : i32
    %c0_i32_0 = arith.constant 0 : i32
    return %arg0, %c0_i32 : i32, i32
  }
}

</mosaic_0001>

<bundles_post_ra>
// kernel: conv_bn_act.2
= control target key start
LH: loop header
LB: loop body
LE: loop exit
PB: predicated region body
PF: predicated region fallthrough
CT: control target
= control target key end

     0   :  { %s1572_s21 = smov 0   ;;  %s1574_s22 = smov 0   ;;  %s1975_s0 = inlined_call_operand.vmem [shape: bf16[2048,27], index: 0, kind: input, shape index: {}]   ;;  %s1976_s1 = inlined_call_operand.vmem [shape: bf16[27,64], index: 1, kind: input, shape index: {}]   ;;  %s1977_s2 = inlined_call_operand.vmem [shape: f32[1,64], index: 2, kind: input, shape index: {}, may-alias: {2,3}]   ;;  %s1978_s3 = inlined_call_operand.vmem [shape: f32[1,64], index: 3, kind: input, shape index: {}, may-alias: {2,3}]   ;;  %s1979_s4 = inlined_call_operand.vmem [shape: f32[2048,64], index: 4, kind: output, shape index: {0}]   ;;  %s1980_s5 = inlined_call_operand.vmem [shape: f32[64,64], index: 5, kind: output, shape index: {1}]   ;;  %s1981_s6 = inlined_call_operand.vmem [shape: f32[64,64], index: 6, kind: output, shape index: {2}]  }
   0x1   :  { %s1576_s23 = smov 0  }
   0x2 LB: > { %s36_s3 = sadd.s32 1, %s1529_s22  ;;  %p1365_p0 = scmp.ge.s32.totalorder %s1533_s23, 1  ;;  %s1533_s23 = sphi %s1576_s23, %s17_s23   ;;  %s1529_s22 = sphi %s1574_s22, %s1984_s22   ;;  %s1525_s21 = sphi %s1572_s21, %s1983_s21  }
   0x3   : > { %p38_p1 = scmp.ge.s32.totalorder %s36_s3, 8  ;;  %p280_p2 = scmp.lt.s32.totalorder %s1533_s23, 9 }
   0x5   : > { %s1986_s3 = smov (%p38_p1, %s36_s3), 0  ;;  %p281_p3 = pnand %p1365_p0, %p280_p2 }
   0x6   : > { %s1366_s26 = sshll.u32 (!%p281_p3), %s1525_s21, 5  ;;  %p377_p5 = scmp.lt.s32.totalorder (!%p281_p3), %s1525_s21, 7 }
   0x7   : > { %284 = sbr.rel (%p281_p3) target bundleno = 313 (0x139), region = 36  ;;  %p1598_p4 = scmp.lt.s32.totalorder (!%p281_p3), %s1366_s26, 255 }
   0xc   : > { %v1493_v0 = vld [vmem:[%s1976_s1 + $0x8] sm:$0x3f]   ;;  %vm637_vm0 = vcmask 1044480   ;;  %vm638_vm1 = vcmask 1045504   ;;  %v1535_v1 = vmov 65535   ;;  %vm396_vm2 = vcmask 523264  }
   0xd   : > { %v639_v2 = vsel %vm637_vm0, 4294967295, %v1535_v1  ;;  %v1494_v5 = vld [vmem:[%s1976_s1] sm:$0xff]   ;;  %v1536_v6 = vmov 0.0   ;;  %s1988_s26 = smov (!%p1598_p4, %s1366_s26), 255  ;;  %vm588_vm3 = vcmask 220160   ;;  %s1990_s21 = smov (!%p377_p5, %s1525_s21), 7 }
   0xe   : > { %v640_v3 = vsel %vm638_vm1, %v639_v2, 0  ;;  %399 = vst.msk [vmem:[#allocation2 + $0x10] sm:$0xff] %vm396_vm2, %v1536_v6  ;;  %397 = vst.msk [vmem:[#allocation2] sm:$0xff] %vm396_vm2, %v1536_v6  ;;  %s1367_s30 = sshll.u32 %s1988_s26, 2  ;;  %s1369_s10 = sshll.u32 %s1988_s26, 3 }
   0xf   : > { %v642_v4 = vand.u32 %v1493_v0, %v640_v3  ;;  %398 = vst.msk [vmem:[#allocation2 + $0x8] sm:$0xff] %vm396_vm2, %v1536_v6  ;;  %400 = vst.msk [vmem:[#allocation2 + $0x18] sm:$0xff] %vm396_vm2, %v1536_v6  ;;  %s1647_s9 = scalar_lea.vmem %s1975_s0, %s1367_s30  ;;  %v1688_v40 = vld [vmem:[%s1977_s2] ss:$0 sm:$0xff]  ;;  %s1695_s15 = scalar_lea.vmem %s1979_s4, %s1369_s10 }
  0x10   : > { %401 = vst.msk [vmem:[#allocation2 + $0x20] sm:$0xff] %vm396_vm2, %v1536_v6  ;;  %402 = vst.msk [vmem:[#allocation2 + $0x28] sm:$0xff] %vm396_vm2, %v1536_v6  ;;  %v1495_v7 = vld [vmem:[%s1647_s9] sm:$0xff]   ;;  %v1496_v8 = vld [vmem:[%s1647_s9 + $0x8] sm:$0xff]   ;;  %s1370_s16 = sshll.u32 %s1990_s21, 3 }
  0x11   : > { %403 = vst.msk [vmem:[#allocation2 + $0x30] sm:$0xff] %vm396_vm2, %v1536_v6  ;;  %404 = vst.msk [vmem:[#allocation2 + $0x38] sm:$0xff] %vm396_vm2, %v1536_v6  ;;  %1427 = vmatprep.subr.bf16.mxu0 %v642_v4  ;;  %1463 = vmatprep.subr.bf16.mxu1 %v642_v4  ;;  %v1497_v9 = vld [vmem:[%s1647_s9 + $0x10] sm:$0xff]   ;;  %v1498_v10 = vld [vmem:[%s1647_s9 + $0x18] sm:$0xff]   ;;  %s383_s19 = scalar_lea.vmem %s1980_s5, %s1370_s16  ;;  %s390_s25 = scalar_lea.vmem %s1981_s6, %s1370_s16 }
  0x12   : > { %405 = vst.msk [vmem:[#allocation2 + $0x40] sm:$0xff] %vm396_vm2, %v1536_v6  ;;  %406 = vst.msk [vmem:[#allocation2 + $0x48] sm:$0xff] %vm396_vm2, %v1536_v6  ;;  %1428 = vmatpush3.bf16.msra.mxu0 %v642_v4  ;;  %1465 = vmatpush3.bf16.msra.mxu1 %v642_v4  ;;  %v1499_v11 = vld [vmem:[%s1647_s9 + $0x20] sm:$0xff]   ;;  %v1504_v13 = vld [vmem:[%s1647_s9 + $0x48] sm:$0xff]  }
  0x13   : > { %407 = vst.msk [vmem:[#allocation2 + $0x50] sm:$0xff] %vm396_vm2, %v1536_v6  ;;  %408 = vst.msk [vmem:[#allocation2 + $0x58] sm:$0xff] %vm396_vm2, %v1536_v6  ;;  %1429 = vmatprep.subr.bf16.mxu0 %v1494_v5  ;;  %1464 = vmatprep.subr.bf16.mxu1 %v1494_v5  ;;  %v1503_v12 = vld [vmem:[%s1647_s9 + $0x40] sm:$0xff]   ;;  %v1505_v14 = vld [vmem:[%s1647_s9 + $0x50] sm:$0xff]  }
  0x14   : > { %409 = vst.msk [vmem:[#allocation2 + $0x60] sm:$0xff] %vm396_vm2, %v1536_v6  ;;  %410 = vst.msk [vmem:[#allocation2 + $0x68] sm:$0xff] %vm396_vm2, %v1536_v6  ;;  %1431 = vmatprep.mubr.msk.bf16.mxu0 %vm588_vm3, %v1495_v7  ;;  %1447 = vmatprep.mubr.msk.bf16.mxu1 %vm588_vm3, %v1503_v12  ;;  %v1506_v15 = vld [vmem:[%s1647_s9 + $0x58] sm:$0xff]   ;;  %v1507_v16 = vld [vmem:[%s1647_s9 + $0x60] sm:$0xff]  }
  0x15   : > { %411 = vst.msk [vmem:[#allocation2 + $0x70] sm:$0xff] %vm396_vm2, %v1536_v6  ;;  %412 = vst.msk [vmem:[#allocation2 + $0x78] sm:$0xff] %vm396_vm2, %v1536_v6  ;;  %v1500_v17 = vld [vmem:[%s1647_s9 + $0x28] sm:$0xff]   ;;  %v1501_v18 = vld [vmem:[%s1647_s9 + $0x30] sm:$0xff]  }
  0x16   : > { %413 = vst.msk [vmem:[#allocation2 + $0x80] sm:$0xff] %vm396_vm2, %v1536_v6  ;;  %414 = vst.msk [vmem:[#allocation2 + $0x88] sm:$0xff] %vm396_vm2, %v1536_v6  ;;  %1430 = vmatpush3.bf16.msra.mxu0 %v1494_v5  ;;  %1466 = vmatpush3.bf16.msra.mxu1 %v1494_v5  ;;  %v1508_v19 = vld [vmem:[%s1647_s9 + $0x68] sm:$0xff]   ;;  %v1509_v20 = vld [vmem:[%s1647_s9 + $0x70] sm:$0xff]  }
  0x17   : > { %415 = vst.msk [vmem:[#allocation2 + $0x90] sm:$0xff] %vm396_vm2, %v1536_v6  ;;  %416 = vst.msk [vmem:[#allocation2 + $0x98] sm:$0xff] %vm396_vm2, %v1536_v6  ;;  %v1502_v21 = vld [vmem:[%s1647_s9 + $0x38] sm:$0xff]   ;;  %v431_v23 = vld [vmem:[#allocation2 + $0x10] sm:$0xff] }
  0x18   : > { %417 = vst.msk [vmem:[#allocation2 + $0xa0] sm:$0xff] %vm396_vm2, %v1536_v6  ;;  %418 = vst.msk [vmem:[#allocation2 + $0xa8] sm:$0xff] %vm396_vm2, %v1536_v6  ;;  %v1510_v22 = vld [vmem:[%s1647_s9 + $0x78] sm:$0xff]   ;;  %v429_v25 = vld [vmem:[#allocation2] sm:$0xff] }
  0x19   : > { %419 = vst.msk [vmem:[#allocation2 + $0xb0] sm:$0xff] %vm396_vm2, %v1536_v6  ;;  %420 = vst.msk [vmem:[#allocation2 + $0xb8] sm:$0xff] %vm396_vm2, %v1536_v6  ;;  %1432 = vmatmul.mubr.msk.bf16.vlgmr.msra.gmra.mxu0 %vm588_vm3, %v1496_v8  ;;  %1448 = vmatmul.mubr.msk.bf16.vlgmr.msra.gmra.mxu1 %vm588_vm3, %v1504_v13  ;;  %v432_v28 = vld [vmem:[#allocation2 + $0x18] sm:$0xff]  ;;  %v430_v31 = vld [vmem:[#allocation2 + $0x8] sm:$0xff] }
  0x1a   : > { %421 = vst.msk [vmem:[#allocation2 + $0xc0] sm:$0xff] %vm396_vm2, %v1536_v6  ;;  %422 = vst.msk [vmem:[#allocation2 + $0xc8] sm:$0xff] %vm396_vm2, %v1536_v6  ;;  %1435 = vmatprep.mubr.msk.bf16.mxu0 %vm588_vm3, %v1497_v9  ;;  %1451 = vmatprep.mubr.msk.bf16.mxu1 %vm588_vm3, %v1505_v14  ;;  %v435_v35 = vld [vmem:[#allocation2 + $0x30] sm:$0xff]  ;;  %v433_v42 = vld [vmem:[#allocation2 + $0x20] sm:$0xff] }
  0x1b   : > { %423 = vst.msk [vmem:[#allocation2 + $0xd0] sm:$0xff] %vm396_vm2, %v1536_v6  ;;  %424 = vst.msk [vmem:[#allocation2 + $0xd8] sm:$0xff] %vm396_vm2, %v1536_v6  ;;  %v436_v52 = vld [vmem:[#allocation2 + $0x38] sm:$0xff]  ;;  %v434_v59 = vld [vmem:[#allocation2 + $0x28] sm:$0xff] }
  0x1c   : > { %425 = vst.msk [vmem:[#allocation2 + $0xe0] sm:$0xff] %vm396_vm2, %v1536_v6  ;;  %426 = vst.msk [vmem:[#allocation2 + $0xe8] sm:$0xff] %vm396_vm2, %v1536_v6  ;;  %v439_v4 = vld [vmem:[#allocation2 + $0x50] sm:$0xff] }
  0x1d   : > { %427 = vst.msk [vmem:[#allocation2 + $0xf0] sm:$0xff] %vm396_vm2, %v1536_v6  ;;  %428 = vst.msk [vmem:[#allocation2 + $0xf8] sm:$0xff] %vm396_vm2, %v1536_v6  ;;  %v445_v37 = vld [vmem:[#allocation2 + $0x80] sm:$0xff]  ;;  %v446_v53 = vld [vmem:[#allocation2 + $0x88] sm:$0xff] }
  0x1e   : > { %v447_v32 = vld [vmem:[#allocation2 + $0x90] sm:$0xff]  ;;  %v448_v46 = vld [vmem:[#allocation2 + $0x98] sm:$0xff] }
  0x20   : > { %v451_v60 = vld [vmem:[#allocation2 + $0xb0] sm:$0xff] }
  0x21   : > { %1436 = vmatmul.mubr.msk.bf16.gmra.mxu0 %vm588_vm3, %v1498_v10  ;;  %1452 = vmatmul.mubr.msk.bf16.gmra.mxu1 %vm588_vm3, %v1506_v15  ;;  %v437_v15 = vld [vmem:[#allocation2 + $0x40] sm:$0xff] }
  0x22   : > { %1439 = vmatprep.mubr.msk.bf16.mxu0 %vm588_vm3, %v1499_v11  ;;  %1455 = vmatprep.mubr.msk.bf16.mxu1 %vm588_vm3, %v1507_v16 }
  0x29   : > { %1440 = vmatmul.mubr.msk.bf16.gmra.mxu0 %vm588_vm3, %v1500_v17  ;;  %1456 = vmatmul.mubr.msk.bf16.gmra.mxu1 %vm588_vm3, %v1508_v19 }
  0x2a   : > { %1443 = vmatprep.mubr.msk.bf16.mxu0 %vm588_vm3, %v1501_v18  ;;  %1459 = vmatprep.mubr.msk.bf16.mxu1 %vm588_vm3, %v1509_v20 }
  0x31   : > { %1444 = vmatmul.mubr.msk.bf16.gmra.mxu0 %vm588_vm3, %v1502_v21  ;;  %1460 = vmatmul.mubr.msk.bf16.gmra.mxu1 %vm588_vm3, %v1510_v22 }
  0xd9   : > { %v1433_v24 = vpop.f32.mrf.mxu0  ;;  %v1449_v36 = vpop.f32.mrf.mxu1 }
  0xda   : > { %v807_v26 = vadd.f32 %v1433_v24, %v431_v23  ;;  %v823_v39 = vadd.f32 %v1449_v36, %v447_v32 }
  0xdb   : > { %v678_v27 = vpop.f32.mrf.mxu0  ;;  %v742_v43 = vpop.f32.mrf.mxu1 }
  0xdc   : > { %840 = vst.msk [vmem:[#allocation2 + $0x10] sm:$0xff] %vm396_vm2, %v807_v26  ;;  %v805_v29 = vadd.f32 %v678_v27, %v429_v25  ;;  %856 = vst.msk [vmem:[#allocation2 + $0x90] sm:$0xff] %vm396_vm2, %v823_v39  ;;  %v821_v45 = vadd.f32 %v742_v43, %v445_v37  ;;  %v440_v26 = vld [vmem:[#allocation2 + $0x58] sm:$0xff] }
  0xdd   : > { %v1434_v30 = vpop.f32.mrf.mxu0  ;;  %v1450_v49 = vpop.f32.mrf.mxu1 }
  0xde   : > { %838 = vst.msk [vmem:[#allocation2] sm:$0xff] %vm396_vm2, %v805_v29  ;;  %v808_v33 = vadd.f32 %v1434_v30, %v432_v28  ;;  %854 = vst.msk [vmem:[#allocation2 + $0x80] sm:$0xff] %vm396_vm2, %v821_v45  ;;  %v824_v56 = vadd.f32 %v1450_v49, %v448_v46 }
  0xdf   : > { %v681_v34 = vpop.f32.mrf.mxu0  ;;  %v745_v57 = vpop.f32.mrf.mxu1 }
  0xe0   : > { %841 = vst.msk [vmem:[#allocation2 + $0x18] sm:$0xff] %vm396_vm2, %v808_v33  ;;  %v806_v38 = vadd.f32 %v681_v34, %v430_v31  ;;  %857 = vst.msk [vmem:[#allocation2 + $0x98] sm:$0xff] %vm396_vm2, %v824_v56  ;;  %v822_v0 = vadd.f32 %v745_v57, %v446_v53  ;;  %v438_v33 = vld [vmem:[#allocation2 + $0x48] sm:$0xff] }
  0xe1   : > { %v1437_v41 = vpop.f32.mrf.mxu0  ;;  %v1453_v1 = vpop.f32.mrf.mxu1 }
  0xe2   : > { %839 = vst.msk [vmem:[#allocation2 + $0x8] sm:$0xff] %vm396_vm2, %v806_v38  ;;  %v811_v44 = vadd.f32 %v1437_v41, %v435_v35  ;;  %855 = vst.msk [vmem:[#allocation2 + $0x88] sm:$0xff] %vm396_vm2, %v822_v0  ;;  %v827_v9 = vadd.f32 %v1453_v1, %v451_v60 }
  0xe3   : > { %v875_v47 = vld [vmem:[#allocation2 + $0x10] sm:$0xff]  ;;  %v694_v48 = vpop.f32.mrf.mxu0  ;;  %v1710_v10 = vpop.f32.mrf.mxu1 }
  0xe4   : > { %v1091_v50 = vadd.f32 %v1688_v40, %v875_v47  ;;  %844 = vst.msk [vmem:[#allocation2 + $0x30] sm:$0xff] %vm396_vm2, %v811_v44  ;;  %v809_v51 = vadd.f32 %v694_v48, %v433_v42  ;;  %v981_v5 = vmul.f32 %v875_v47, %v875_v47  ;;  %v911_v16 = vsel %vm396_vm2, %v875_v47, 0.0  ;;  %860 = vst.msk [vmem:[#allocation2 + $0xb0] sm:$0xff] %vm396_vm2, %v827_v9  ;;  %v1730_v27 = vld [vmem:[#allocation2 + $0x90] sm:$0xff] }
  0xe5   : > { %v873_v54 = vld [vmem:[#allocation2] sm:$0xff]  ;;  %v1438_v55 = vpop.f32.mrf.mxu0  ;;  %v1722_v21 = vpop.f32.mrf.mxu1  ;;  %v443_v44 = vld [vmem:[#allocation2 + $0x70] sm:$0xff]  ;;  %v1107_v45 = vadd.f32 %v1688_v40, %v1730_v27 }
  0xe6   : > { %1123 = vst.msk [vmem:[%s1695_s15 + $0x10] sm:$0xff] %vm396_vm2, %v1091_v50  ;;  %v1089_v58 = vadd.f32 %v1688_v40, %v873_v54  ;;  %842 = vst.msk [vmem:[#allocation2 + $0x20] sm:$0xff] %vm396_vm2, %v809_v51  ;;  %v812_v62 = vadd.f32 %v1438_v55, %v436_v52  ;;  %v979_v2 = vmul.f32 %v873_v54, %v873_v54  ;;  %v908_v11 = vsel %vm396_vm2, %v873_v54, 0.0  ;;  %v1743_v46 = vld [vmem:[#allocation2 + $0x80] sm:$0xff] }
  0xe7   : > { %v876_v61 = vld [vmem:[#allocation2 + $0x18] sm:$0xff]  ;;  %v697_v63 = vpop.f32.mrf.mxu0  ;;  %v1733_v34 = vpop.f32.mrf.mxu1  ;;  %v1014_v35 = vsel %vm396_vm2, %v981_v5, 0.0  ;;  %v441_v55 = vld [vmem:[#allocation2 + $0x60] sm:$0xff]  ;;  %1139 = vst.msk [vmem:[%s1695_s15 + $0x90] sm:$0xff] %vm396_vm2, %v1107_v45 }
  0xe8   : > { %1121 = vst.msk [vmem:[%s1695_s15] sm:$0xff] %vm396_vm2, %v1089_v58  ;;  %v1092_v3 = vadd.f32 %v1688_v40, %v876_v61  ;;  %845 = vst.msk [vmem:[#allocation2 + $0x38] sm:$0xff] %vm396_vm2, %v812_v62  ;;  %v810_v7 = vadd.f32 %v697_v63, %v434_v59  ;;  %v1011_v22 = vsel %vm396_vm2, %v979_v2, 0.0  ;;  %v982_v23 = vmul.f32 %v876_v61, %v876_v61 }
  0xe9   : > { %v874_v6 = vld [vmem:[#allocation2 + $0x8] sm:$0xff]  ;;  %v1441_v8 = vpop.f32.mrf.mxu0  ;;  %v913_v36 = vsel %vm396_vm2, %v876_v61, 0.0  ;;  %v1745_v47 = vpop.f32.mrf.mxu1  ;;  %v1105_v61 = vadd.f32 %v1688_v40, %v1743_v46 }
  0xea   : > { %1124 = vst.msk [vmem:[%s1695_s15 + $0x18] sm:$0xff] %vm396_vm2, %v1092_v3  ;;  %v909_v12 = vsel %vm396_vm2, %v874_v6, 0.0  ;;  %v980_v13 = vmul.f32 %v874_v6, %v874_v6  ;;  %v1090_v14 = vadd.f32 %v1688_v40, %v874_v6  ;;  %843 = vst.msk [vmem:[#allocation2 + $0x28] sm:$0xff] %vm396_vm2, %v810_v7  ;;  %v815_v19 = vadd.f32 %v1441_v8, %v439_v4  ;;  %v444_v3 = vld [vmem:[#allocation2 + $0x78] sm:$0xff] }
  0xeb   : > { %v910_v17 = vadd.f32 %v909_v12, %v908_v11  ;;  %v1718_v18 = vld [vmem:[#allocation2 + $0x30] sm:$0xff]  ;;  %v710_v20 = vpop.f32.mrf.mxu0  ;;  %v1016_v48 = vsel %vm396_vm2, %v982_v23, 0.0  ;;  %v1754_v56 = vpop.f32.mrf.mxu1  ;;  %1137 = vst.msk [vmem:[%s1695_s15 + $0x80] sm:$0xff] %vm396_vm2, %v1105_v61 }
  0xec   : > { %v1012_v24 = vsel %vm396_vm2, %v980_v13, 0.0  ;;  %1122 = vst.msk [vmem:[%s1695_s15 + $0x8] sm:$0xff] %vm396_vm2, %v1090_v14  ;;  %v1095_v25 = vadd.f32 %v1688_v40, %v1718_v18  ;;  %848 = vst.msk [vmem:[#allocation2 + $0x50] sm:$0xff] %vm396_vm2, %v815_v19  ;;  %v813_v31 = vadd.f32 %v710_v20, %v437_v15  ;;  %v985_v62 = vmul.f32 %v1718_v18, %v1718_v18  ;;  %v442_v15 = vld [vmem:[#allocation2 + $0x68] sm:$0xff] }
  0xed   : > { %v912_v28 = vadd.f32 %v911_v16, %v910_v17  ;;  %v1013_v29 = vadd.f32 %v1012_v24, %v1011_v22  ;;  %v877_v30 = vld [vmem:[#allocation2 + $0x20] sm:$0xff]  ;;  %v1442_v32 = vpop.f32.mrf.mxu0  ;;  %v1764_v4 = vpop.f32.mrf.mxu1  ;;  %v919_v9 = vsel %vm396_vm2, %v1718_v18, 0.0 }
  0xee   : > { %1127 = vst.msk [vmem:[%s1695_s15 + $0x30] sm:$0xff] %vm396_vm2, %v1095_v25  ;;  %v983_v37 = vmul.f32 %v877_v30, %v877_v30  ;;  %v1093_v38 = vadd.f32 %v1688_v40, %v877_v30  ;;  %846 = vst.msk [vmem:[#allocation2 + $0x40] sm:$0xff] %vm396_vm2, %v813_v31  ;;  %v816_v42 = vadd.f32 %v1442_v32, %v440_v26  ;;  %v915_v49 = vsel %vm396_vm2, %v877_v30, 0.0  ;;  %v1787_v32 = vld [vmem:[#allocation2 + $0x98] sm:$0xff] }
  0xef   : > { %v1015_v39 = vadd.f32 %v1014_v35, %v1013_v29  ;;  %v914_v41 = vadd.f32 %v913_v36, %v912_v28  ;;  %v713_v43 = vpop.f32.mrf.mxu0  ;;  %v880_v50 = vld [vmem:[#allocation2 + $0x38] sm:$0xff]  ;;  %v1776_v16 = vpop.f32.mrf.mxu1  ;;  %v1022_v18 = vsel %vm396_vm2, %v985_v62, 0.0 }
  0xf0   : > { %1125 = vst.msk [vmem:[%s1695_s15 + $0x20] sm:$0xff] %vm396_vm2, %v1093_v38  ;;  %v814_v51 = vadd.f32 %v713_v43, %v438_v33  ;;  %849 = vst.msk [vmem:[#allocation2 + $0x58] sm:$0xff] %vm396_vm2, %v816_v42  ;;  %v1018_v57 = vsel %vm396_vm2, %v983_v37, 0.0  ;;  %v1096_v58 = vadd.f32 %v1688_v40, %v880_v50  ;;  %v986_v11 = vmul.f32 %v880_v50, %v880_v50 }
  0xf1   : > { %v916_v52 = vadd.f32 %v915_v49, %v914_v41  ;;  %v1017_v53 = vadd.f32 %v1016_v48, %v1015_v39  ;;  %v1445_v54 = vpop.f32.mrf.mxu0  ;;  %v878_v59 = vld [vmem:[#allocation2 + $0x28] sm:$0xff]  ;;  %v921_v23 = vsel %vm396_vm2, %v880_v50, 0.0  ;;  %v1789_v33 = vpop.f32.mrf.mxu1 }
  0xf2   : > { %847 = vst.msk [vmem:[#allocation2 + $0x48] sm:$0xff] %vm396_vm2, %v814_v51  ;;  %v819_v60 = vadd.f32 %v1445_v54, %v443_v44  ;;  %v917_v0 = vsel %vm396_vm2, %v878_v59, 0.0  ;;  %v984_v1 = vmul.f32 %v878_v59, %v878_v59  ;;  %1128 = vst.msk [vmem:[%s1695_s15 + $0x38] sm:$0xff] %vm396_vm2, %v1096_v58  ;;  %v1094_v6 = vadd.f32 %v1688_v40, %v878_v59  ;;  %v1798_v44 = vld [vmem:[#allocation2 + $0x88] sm:$0xff] }
  0xf3   : > { %v1019_v63 = vadd.f32 %v1018_v57, %v1017_v53  ;;  %v726_v2 = vpop.f32.mrf.mxu0  ;;  %v918_v5 = vadd.f32 %v917_v0, %v916_v52  ;;  %v883_v7 = vld [vmem:[#allocation2 + $0x50] sm:$0xff]  ;;  %v1024_v35 = vsel %vm396_vm2, %v986_v11, 0.0  ;;  %v1108_v51 = vadd.f32 %v1688_v40, %v1787_v32  ;;  %v1807_v57 = vpop.f32.mrf.mxu1 }
  0xf4   : > { %852 = vst.msk [vmem:[#allocation2 + $0x70] sm:$0xff] %vm396_vm2, %v819_v60  ;;  %v817_v8 = vadd.f32 %v726_v2, %v441_v55  ;;  %v1020_v12 = vsel %vm396_vm2, %v984_v1, 0.0  ;;  %v1099_v13 = vadd.f32 %v1688_v40, %v883_v7  ;;  %1126 = vst.msk [vmem:[%s1695_s15 + $0x28] sm:$0xff] %vm396_vm2, %v1094_v6  ;;  %v989_v45 = vmul.f32 %v883_v7, %v883_v7  ;;  %v1821_v2 = vld [vmem:[#allocation2 + $0xb0] sm:$0xff] }
  0xf5   : > { %v1446_v14 = vpop.f32.mrf.mxu0  ;;  %v920_v17 = vadd.f32 %v919_v9, %v918_v5  ;;  %v1021_v19 = vadd.f32 %v1020_v12, %v1019_v63  ;;  %v881_v20 = vld [vmem:[#allocation2 + $0x40] sm:$0xff]  ;;  %v927_v58 = vsel %vm396_vm2, %v883_v7, 0.0  ;;  %1140 = vst.msk [vmem:[%s1695_s15 + $0x98] sm:$0xff] %vm396_vm2, %v1108_v51  ;;  %v1106_v62 = vadd.f32 %v1688_v40, %v1798_v44  ;;  %v460_v51 = vld [vmem:[#allocation2 + $0xf8] sm:$0xff] }
  0xf6   : > { %850 = vst.msk [vmem:[#allocation2 + $0x60] sm:$0xff] %vm396_vm2, %v817_v8  ;;  %v820_v22 = vadd.f32 %v1446_v14, %v444_v3  ;;  %1131 = vst.msk [vmem:[%s1695_s15 + $0x50] sm:$0xff] %vm396_vm2, %v1099_v13  ;;  %v987_v24 = vmul.f32 %v881_v20, %v881_v20  ;;  %v1097_v25 = vadd.f32 %v1688_v40, %v881_v20  ;;  %v923_v36 = vsel %vm396_vm2, %v881_v20, 0.0  ;;  %v449_v14 = vld [vmem:[#allocation2 + $0xa0] sm:$0xff] }
  0xf7   : > { %v729_v26 = vpop.f32.mrf.mxu0  ;;  %v1023_v28 = vadd.f32 %v1022_v18, %v1021_v19  ;;  %v922_v29 = vadd.f32 %v921_v23, %v920_v17  ;;  %v884_v30 = vld [vmem:[#allocation2 + $0x58] sm:$0xff]  ;;  %v1819_v1 = vmul.f32 %v1743_v46, %v1743_v46  ;;  %v1030_v3 = vsel %vm396_vm2, %v989_v45, 0.0  ;;  %1138 = vst.msk [vmem:[%s1695_s15 + $0x88] sm:$0xff] %vm396_vm2, %v1106_v62 }
  0xf8   : > { %853 = vst.msk [vmem:[#allocation2 + $0x78] sm:$0xff] %vm396_vm2, %v820_v22  ;;  %v818_v31 = vadd.f32 %v729_v26, %v442_v15  ;;  %1129 = vst.msk [vmem:[%s1695_s15 + $0x40] sm:$0xff] %vm396_vm2, %v1097_v25  ;;  %v1100_v37 = vadd.f32 %v1688_v40, %v884_v30  ;;  %v1026_v48 = vsel %vm396_vm2, %v987_v24, 0.0  ;;  %v990_v53 = vmul.f32 %v884_v30, %v884_v30  ;;  %v1462_v15 = vpop.f32.mrf.mxu1  ;;  %v452_v23 = vld [vmem:[#allocation2 + $0xb8] sm:$0xff]  ;;  %v450_v24 = vld [vmem:[#allocation2 + $0xa8] sm:$0xff] }
  0xf9   : > { %v882_v38 = vld [vmem:[#allocation2 + $0x48] sm:$0xff]  ;;  %v924_v39 = vadd.f32 %v923_v36, %v922_v29  ;;  %v1025_v41 = vadd.f32 %v1024_v35, %v1023_v28  ;;  %v929_v5 = vsel %vm396_vm2, %v884_v30, 0.0  ;;  %v1111_v18 = vadd.f32 %v1688_v40, %v1821_v2  ;;  %v455_v30 = vld [vmem:[#allocation2 + $0xd0] sm:$0xff]  ;;  %v456_v35 = vld [vmem:[#allocation2 + $0xd8] sm:$0xff] }
  0xfa   : > { %v925_v42 = vsel %vm396_vm2, %v882_v38, 0.0  ;;  %v988_v43 = vmul.f32 %v882_v38, %v882_v38  ;;  %851 = vst.msk [vmem:[#allocation2 + $0x68] sm:$0xff] %vm396_vm2, %v818_v31  ;;  %1132 = vst.msk [vmem:[%s1695_s15 + $0x58] sm:$0xff] %vm396_vm2, %v1100_v37  ;;  %v1098_v49 = vadd.f32 %v1688_v40, %v882_v38  ;;  %v1032_v9 = vsel %vm396_vm2, %v990_v53, 0.0  ;;  %v453_v31 = vld [vmem:[#allocation2 + $0xc0] sm:$0xff]  ;;  %v793_v53 = vpop.f32.mrf.mxu1 }
  0xfb   : > { %v887_v50 = vld [vmem:[#allocation2 + $0x70] sm:$0xff]  ;;  %v1027_v52 = vadd.f32 %v1026_v48, %v1025_v41  ;;  %v926_v54 = vadd.f32 %v925_v42, %v924_v39  ;;  %1143 = vst.msk [vmem:[%s1695_s15 + $0xb0] sm:$0xff] %vm396_vm2, %v1111_v18  ;;  %v825_v39 = vadd.f32 %v1710_v10, %v449_v14  ;;  %v454_v41 = vld [vmem:[#allocation2 + $0xc8] sm:$0xff]  ;;  %v831_v10 = vadd.f32 %v1745_v47, %v455_v30 }
  0xfc   : > { %v1028_v55 = vsel %vm396_vm2, %v988_v43, 0.0  ;;  %1130 = vst.msk [vmem:[%s1695_s15 + $0x48] sm:$0xff] %vm396_vm2, %v1098_v49  ;;  %v993_v59 = vmul.f32 %v887_v50, %v887_v50  ;;  %v1103_v60 = vadd.f32 %v1688_v40, %v887_v50  ;;  %v935_v12 = vsel %vm396_vm2, %v887_v50, 0.0  ;;  %v459_v42 = vld [vmem:[#allocation2 + $0xf0] sm:$0xff]  ;;  %v457_v50 = vld [vmem:[#allocation2 + $0xe0] sm:$0xff] }
  0xfd   : > { %v885_v61 = vld [vmem:[#allocation2 + $0x60] sm:$0xff]  ;;  %v928_v63 = vadd.f32 %v927_v58, %v926_v54  ;;  %v1029_v0 = vadd.f32 %v1028_v55, %v1027_v52  ;;  %v828_v49 = vadd.f32 %v1722_v21, %v452_v23  ;;  %v458_v52 = vld [vmem:[#allocation2 + $0xe8] sm:$0xff]  ;;  %858 = vst.msk [vmem:[#allocation2 + $0xa0] sm:$0xff] %vm396_vm2, %v825_v39  ;;  %v826_v54 = vadd.f32 %v1733_v34, %v450_v24 }
  0xfe   : > { %1135 = vst.msk [vmem:[%s1695_s15 + $0x70] sm:$0xff] %vm396_vm2, %v1103_v60  ;;  %v991_v6 = vmul.f32 %v885_v61, %v885_v61  ;;  %v1101_v7 = vadd.f32 %v1688_v40, %v885_v61  ;;  %v1038_v17 = vsel %vm396_vm2, %v993_v59, 0.0  ;;  %v931_v19 = vsel %vm396_vm2, %v885_v61, 0.0  ;;  %864 = vst.msk [vmem:[#allocation2 + $0xd0] sm:$0xff] %vm396_vm2, %v831_v10 }
  0xff   : > { %v888_v8 = vld [vmem:[#allocation2 + $0x78] sm:$0xff]  ;;  %v1031_v11 = vadd.f32 %v1030_v3, %v1029_v0  ;;  %v930_v13 = vadd.f32 %v929_v5, %v928_v63  ;;  %v829_v55 = vadd.f32 %v1754_v56, %v453_v31  ;;  %v832_v58 = vadd.f32 %v1764_v4, %v456_v35  ;;  %861 = vst.msk [vmem:[#allocation2 + $0xb8] sm:$0xff] %vm396_vm2, %v828_v49 }
 0x100   : > { %1133 = vst.msk [vmem:[%s1695_s15 + $0x60] sm:$0xff] %vm396_vm2, %v1101_v7  ;;  %v1104_v20 = vadd.f32 %v1688_v40, %v888_v8  ;;  %v1034_v36 = vsel %vm396_vm2, %v991_v6, 0.0  ;;  %v994_v37 = vmul.f32 %v888_v8, %v888_v8  ;;  %v830_v21 = vadd.f32 %v1776_v16, %v454_v41  ;;  %859 = vst.msk [vmem:[#allocation2 + $0xa8] sm:$0xff] %vm396_vm2, %v826_v54 }
 0x101   : > { %v886_v22 = vld [vmem:[#allocation2 + $0x68] sm:$0xff]  ;;  %v932_v25 = vadd.f32 %v931_v19, %v930_v13  ;;  %v1033_v26 = vadd.f32 %v1032_v9, %v1031_v11  ;;  %v835_v61 = vadd.f32 %v1789_v33, %v459_v42  ;;  %v937_v62 = vsel %vm396_vm2, %v888_v8, 0.0  ;;  %862 = vst.msk [vmem:[#allocation2 + $0xc0] sm:$0xff] %vm396_vm2, %v829_v55  ;;  %865 = vst.msk [vmem:[#allocation2 + $0xd8] sm:$0xff] %vm396_vm2, %v832_v58 }
 0x102   : > { %v933_v28 = vsel %vm396_vm2, %v886_v22, 0.0  ;;  %v992_v29 = vmul.f32 %v886_v22, %v886_v22  ;;  %1136 = vst.msk [vmem:[%s1695_s15 + $0x78] sm:$0xff] %vm396_vm2, %v1104_v20  ;;  %v1102_v38 = vadd.f32 %v1688_v40, %v886_v22  ;;  %v833_v34 = vadd.f32 %v1807_v57, %v457_v50  ;;  %863 = vst.msk [vmem:[#allocation2 + $0xc8] sm:$0xff] %vm396_vm2, %v830_v21 }
 0x103   : > { %v1035_v43 = vadd.f32 %v1034_v36, %v1033_v26  ;;  %v934_v45 = vadd.f32 %v933_v28, %v932_v25  ;;  %v836_v47 = vadd.f32 %v1462_v15, %v460_v51  ;;  %v834_v56 = vadd.f32 %v793_v53, %v458_v52  ;;  %868 = vst.msk [vmem:[#allocation2 + $0xf0] sm:$0xff] %vm396_vm2, %v835_v61 }
 0x104   : > { %v1036_v48 = vsel %vm396_vm2, %v992_v29, 0.0  ;;  %1134 = vst.msk [vmem:[%s1695_s15 + $0x68] sm:$0xff] %vm396_vm2, %v1102_v38  ;;  %v1040_v16 = vsel %vm396_vm2, %v994_v37, 0.0  ;;  %v939_v33 = vsel %vm396_vm2, %v1743_v46, 0.0  ;;  %v996_v0 = vmul.f32 %v1798_v44, %v1798_v44  ;;  %866 = vst.msk [vmem:[#allocation2 + $0xe0] sm:$0xff] %vm396_vm2, %v833_v34  ;;  %v893_v9 = vld [vmem:[#allocation2 + $0xa0] sm:$0xff] }
 0x105   : > { %v936_v59 = vadd.f32 %v935_v12, %v934_v45  ;;  %v1037_v60 = vadd.f32 %v1036_v48, %v1035_v43  ;;  %869 = vst.msk [vmem:[#allocation2 + $0xf8] sm:$0xff] %vm396_vm2, %v836_v47  ;;  %867 = vst.msk [vmem:[#allocation2 + $0xe8] sm:$0xff] %vm396_vm2, %v834_v56  ;;  %v997_v5 = vmul.f32 %v1730_v27, %v1730_v27  ;;  %v1042_v6 = vsel %vm396_vm2, %v1819_v1, 0.0 }
 0x106   : > { %v941_v46 = vsel %vm396_vm2, %v1798_v44, 0.0  ;;  %v943_v11 = vsel %vm396_vm2, %v1730_v27, 0.0  ;;  %v998_v12 = vmul.f32 %v1787_v32, %v1787_v32  ;;  %v1044_v13 = vsel %vm396_vm2, %v996_v0, 0.0  ;;  %v896_v15 = vld [vmem:[#allocation2 + $0xb8] sm:$0xff]  ;;  %v1887_v44 = vld [vmem:[#allocation2 + $0xd0] sm:$0xff] }
 0x107   : > { %v1039_v4 = vadd.f32 %v1038_v17, %v1037_v60  ;;  %v938_v63 = vadd.f32 %v937_v62, %v936_v59  ;;  %v1109_v14 = vadd.f32 %v1688_v40, %v893_v9  ;;  %v894_v19 = vld [vmem:[#allocation2 + $0xa8] sm:$0xff]  ;;  %v1046_v20 = vsel %vm396_vm2, %v997_v5, 0.0 }
 0x108   : > { %v945_v22 = vsel %vm396_vm2, %v1787_v32, 0.0  ;;  %v999_v27 = vmul.f32 %v893_v9, %v893_v9  ;;  %v1112_v18 = vadd.f32 %v1688_v40, %v896_v15  ;;  %v1110_v25 = vadd.f32 %v1688_v40, %v894_v19  ;;  %v897_v26 = vld [vmem:[#allocation2 + $0xc0] sm:$0xff]  ;;  %v900_v31 = vld [vmem:[#allocation2 + $0xd8] sm:$0xff] }
 0x109   : > { %v940_v57 = vadd.f32 %v939_v33, %v938_v63  ;;  %v1041_v3 = vadd.f32 %v1040_v16, %v1039_v4  ;;  %1141 = vst.msk [vmem:[%s1695_s15 + $0xa0] sm:$0xff] %vm396_vm2, %v1109_v14  ;;  %v1048_v28 = vsel %vm396_vm2, %v998_v12, 0.0  ;;  %v947_v29 = vsel %vm396_vm2, %v893_v9, 0.0  ;;  %v898_v37 = vld [vmem:[#allocation2 + $0xc8] sm:$0xff] }
 0x10a   : > { %1144 = vst.msk [vmem:[%s1695_s15 + $0xb8] sm:$0xff] %vm396_vm2, %v1112_v18  ;;  %v1000_v30 = vmul.f32 %v894_v19, %v894_v19  ;;  %v1115_v32 = vadd.f32 %v1688_v40, %v1887_v44  ;;  %1142 = vst.msk [vmem:[%s1695_s15 + $0xa8] sm:$0xff] %vm396_vm2, %v1110_v25  ;;  %v1001_v38 = vmul.f32 %v1821_v2, %v1821_v2  ;;  %v1050_v39 = vsel %vm396_vm2, %v999_v27, 0.0  ;;  %v903_v49 = vld [vmem:[#allocation2 + $0xf0] sm:$0xff] }
 0x10b   : > { %v942_v7 = vadd.f32 %v941_v46, %v940_v57  ;;  %v1043_v8 = vadd.f32 %v1042_v6, %v1041_v3  ;;  %v949_v41 = vsel %vm396_vm2, %v894_v19, 0.0  ;;  %v1113_v42 = vadd.f32 %v1688_v40, %v897_v26  ;;  %v901_v54 = vld [vmem:[#allocation2 + $0xe0] sm:$0xff] }
 0x10c   : > { %1147 = vst.msk [vmem:[%s1695_s15 + $0xd0] sm:$0xff] %vm396_vm2, %v1115_v32  ;;  %v1116_v48 = vadd.f32 %v1688_v40, %v900_v31  ;;  %v951_v50 = vsel %vm396_vm2, %v1821_v2, 0.0  ;;  %v1002_v51 = vmul.f32 %v896_v15, %v896_v15  ;;  %v1052_v52 = vsel %vm396_vm2, %v1000_v30, 0.0  ;;  %v904_v58 = vld [vmem:[#allocation2 + $0xf8] sm:$0xff]  ;;  %v902_v47 = vld [vmem:[#allocation2 + $0xe8] sm:$0xff] }
 0x10d   : > { %v944_v1 = vadd.f32 %v943_v11, %v942_v7  ;;  %v1045_v17 = vadd.f32 %v1044_v13, %v1043_v8  ;;  %1145 = vst.msk [vmem:[%s1695_s15 + $0xc0] sm:$0xff] %vm396_vm2, %v1113_v42  ;;  %v1114_v53 = vadd.f32 %v1688_v40, %v898_v37  ;;  %v1054_v59 = vsel %vm396_vm2, %v1001_v38, 0.0 }
 0x10e   : > { %1148 = vst.msk [vmem:[%s1695_s15 + $0xd8] sm:$0xff] %vm396_vm2, %v1116_v48  ;;  %v953_v60 = vsel %vm396_vm2, %v896_v15, 0.0  ;;  %v1003_v2 = vmul.f32 %v897_v26, %v897_v26  ;;  %v1119_v21 = vadd.f32 %v1688_v40, %v903_v49  ;;  %v1117_v34 = vadd.f32 %v1688_v40, %v901_v54 }
 0x10f   : > { %v1047_v23 = vadd.f32 %v1046_v20, %v1045_v17  ;;  %v946_v24 = vadd.f32 %v945_v22, %v944_v1  ;;  %1146 = vst.msk [vmem:[%s1695_s15 + $0xc8] sm:$0xff] %vm396_vm2, %v1114_v53  ;;  %v1056_v56 = vsel %vm396_vm2, %v1002_v51, 0.0  ;;  %v955_v4 = vsel %vm396_vm2, %v897_v26, 0.0 }
 0x110   : > { %v1004_v63 = vmul.f32 %v898_v37, %v898_v37  ;;  %1151 = vst.msk [vmem:[%s1695_s15 + $0xf0] sm:$0xff] %vm396_vm2, %v1119_v21  ;;  %v1120_v16 = vadd.f32 %v1688_v40, %v904_v58  ;;  %1149 = vst.msk [vmem:[%s1695_s15 + $0xe0] sm:$0xff] %vm396_vm2, %v1117_v34  ;;  %v1005_v57 = vmul.f32 %v1887_v44, %v1887_v44  ;;  %v1058_v3 = vsel %vm396_vm2, %v1003_v2, 0.0 }
 0x111   : > { %v948_v35 = vadd.f32 %v947_v29, %v946_v24  ;;  %v1049_v36 = vadd.f32 %v1048_v28, %v1047_v23  ;;  %v957_v5 = vsel %vm396_vm2, %v898_v37, 0.0  ;;  %v1118_v6 = vadd.f32 %v1688_v40, %v902_v47 }
 0x112   : > { %1152 = vst.msk [vmem:[%s1695_s15 + $0xf8] sm:$0xff] %vm396_vm2, %v1120_v16  ;;  %v959_v8 = vsel %vm396_vm2, %v1887_v44, 0.0  ;;  %v1006_v9 = vmul.f32 %v900_v31, %v900_v31  ;;  %v1060_v11 = vsel %vm396_vm2, %v1004_v63, 0.0  ;;  %v1062_v14 = vsel %vm396_vm2, %v1005_v57, 0.0 }
 0x113   : > { %v1051_v43 = vadd.f32 %v1050_v39, %v1049_v36  ;;  %v950_v45 = vadd.f32 %v949_v41, %v948_v35  ;;  %1150 = vst.msk [vmem:[%s1695_s15 + $0xe8] sm:$0xff] %vm396_vm2, %v1118_v6  ;;  %v961_v15 = vsel %vm396_vm2, %v900_v31, 0.0  ;;  %v1007_v1 = vmul.f32 %v901_v54, %v901_v54 }
 0x114   : > { %v1064_v40 = vsel %vm396_vm2, %v1006_v9, 0.0  ;;  %v963_v20 = vsel %vm396_vm2, %v901_v54, 0.0  ;;  %v1008_v22 = vmul.f32 %v902_v47, %v902_v47  ;;  %v1009_v18 = vmul.f32 %v903_v49, %v903_v49 }
 0x115   : > { %v952_v10 = vadd.f32 %v951_v50, %v950_v45  ;;  %v1053_v55 = vadd.f32 %v1052_v52, %v1051_v43  ;;  %v1066_v23 = vsel %vm396_vm2, %v1007_v1, 0.0  ;;  %v965_v24 = vsel %vm396_vm2, %v902_v47, 0.0 }
 0x116   : > { %v967_v28 = vsel %vm396_vm2, %v903_v49, 0.0  ;;  %v1010_v29 = vmul.f32 %v904_v58, %v904_v58  ;;  %v1068_v30 = vsel %vm396_vm2, %v1008_v22, 0.0  ;;  %v1070_v35 = vsel %vm396_vm2, %v1009_v18, 0.0 }
 0x117   : > { %v1055_v61 = vadd.f32 %v1054_v59, %v1053_v55  ;;  %v954_v62 = vadd.f32 %v953_v60, %v952_v10  ;;  %v969_v36 = vsel %vm396_vm2, %v904_v58, 0.0  ;;  %v905_v43 = vlaneseq }
 0x118   : > { %v1072_v39 = vsel %vm396_vm2, %v1010_v29, 0.0 }
 0x119   : > { %v956_v33 = vadd.f32 %v955_v4, %v954_v62  ;;  %v1057_v0 = vadd.f32 %v1056_v56, %v1055_v61  ;;  %v906_v51 = vshrl.u32 %v905_v43, 7 }
 0x11b   : > { %v1059_v46 = vadd.f32 %v1058_v3, %v1057_v0  ;;  %v958_v7 = vadd.f32 %v957_v5, %v956_v33  ;;  %vm907_vm4 = vcmp.eq.s32.totalorder %v906_v51, 0 }
 0x11d   : > { %v960_v12 = vadd.f32 %v959_v8, %v958_v7  ;;  %v1061_v13 = vadd.f32 %v1060_v11, %v1059_v46 }
 0x11f   : > { %v1063_v17 = vadd.f32 %v1062_v14, %v1061_v13  ;;  %v962_v19 = vadd.f32 %v961_v15, %v960_v12 }
 0x121   : > { %v964_v44 = vadd.f32 %v963_v20, %v962_v19  ;;  %v1065_v27 = vadd.f32 %v1064_v40, %v1063_v17 }
 0x123   : > { %v1067_v25 = vadd.f32 %v1066_v23, %v1065_v27  ;;  %v966_v26 = vadd.f32 %v965_v24, %v964_v44 }
 0x125   : > { %v968_v32 = vadd.f32 %v967_v28, %v966_v26  ;;  %v1069_v31 = vadd.f32 %v1068_v30, %v1067_v25 }
 0x127   : > { %v970_v37 = vadd.f32 %v969_v36, %v968_v32  ;;  %v1071_v38 = vadd.f32 %v1070_v35, %v1069_v31 }
 0x129   : > { %v971_v41 = vrot.slane %v970_v37, 4  ;;  %v1073_v42 = vadd.f32 %v1072_v39, %v1071_v38 }
 0x12b   : > { %v972_v45 = vadd.f32 %v971_v41, %v970_v37  ;;  %v1074_v48 = vrot.slane %v1073_v42, 4 }
 0x12d   : > { %v973_v49 = vrot.slane %v972_v45, 2  ;;  %v1075_v50 = vadd.f32 %v1074_v48, %v1073_v42 }
 0x12f   : > { %v974_v52 = vadd.f32 %v973_v49, %v972_v45  ;;  %v1076_v53 = vrot.slane %v1075_v50, 2 }
 0x131   : > { %v975_v54 = vrot.slane %v974_v52, 1  ;;  %v1077_v10 = vadd.f32 %v1076_v53, %v1075_v50 }
 0x133   : > { %v976_v55 = vadd.f32 %v975_v54, %v974_v52  ;;  %v1078_v58 = vrot.slane %v1077_v10, 1 }
 0x135   : > { %v977_v59 = vsel %vm907_vm4, %v976_v55, 0.0  ;;  %v1079_v60 = vadd.f32 %v1078_v58, %v1077_v10 }
 0x136   : > { %978 = vst.msk [vmem:[%s383_s19] sm:$0xff] %vm396_vm2, %v977_v59 }
 0x137   : > { %v1080_v2 = vsel %vm907_vm4, %v1079_v60, 0.0 }
 0x138   : > { %1081 = vst.msk [vmem:[%s390_s25] sm:$0xff] %vm396_vm2, %v1080_v2 }
 0x139 PF: > { %s17_s23 = sadd.s32 1, %s1533_s23   ;;  %s1983_s21 = smov %s1529_s22 }
 0x13a   : > { %p14_p6 = scmp.ge.s32.totalorder %s17_s23, 10   ;;  %s1984_s22 = smov %s1986_s3 }
 0x13c   :  { %16 = sbr.rel (!%p14_p6) target bundleno = 2 (0x2), region = 107 }

// kernel: conv_bn_act.3
= control target key start
LH: loop header
LB: loop body
LE: loop exit
PB: predicated region body
PF: predicated region fallthrough
CT: control target
= control target key end

     0   :  { %9 = vsyncpa [#allocation3], 0  ;;  %s2254_s0 = inlined_call_operand.vmem [shape: f32[2048,64], index: 0, kind: input, shape index: {}]   ;;  %s2255_s1 = inlined_call_operand.vmem [shape: f32[1,64], index: 1, kind: input, shape index: {}]   ;;  %s2256_s2 = inlined_call_operand.vmem [shape: f32[1,64], index: 2, kind: input, shape index: {}]   ;;  %s2257_s3 = inlined_call_operand.vmem [shape: f32[1,64], index: 3, kind: input, shape index: {}]   ;;  %s2258_s4 = inlined_call_operand.hbm [shape: f32[2048,64], index: 4, kind: output, shape index: {}]  }
   0x1   :  { %11 = vsyncpa [#allocation3 + $0x1], 0  ;;  %s1343_s15 = smov 0   ;;  %s1345_s16 = smov 0  }
   0x2   :  { %s1347_s17 = smov 0   ;;  %s1349_s18 = smov 0  }
   0x3 LB: > { %s1364_s19 = sadd.s32 4294967295, %s1313_s18   ;;  %s1193_s20 = sadd.s32 4294967294, %s1313_s18   ;;  %s1313_s18 = sphi %s1349_s18, %s2264_s18   ;;  %s1309_s17 = sphi %s1347_s17, %s2263_s17   ;;  %s1305_s16 = sphi %s1345_s16, %s2262_s16   ;;  %s1301_s15 = sphi %s1343_s15, %s2261_s15  }
   0x4   : > { %s1368_s21 = sadd.s32 1, %s1313_s18   ;;  %s113_s22 = sadd.s32 1, %s1309_s17 }
   0x5   : > { %s110_s23 = ssub.s32 %s1313_s18, %s1368_s21  ;;  %p123_p0 = scmp.ne.s32.totalorder %s1309_s17, %s1305_s16 }
   0x6   : > { %p111_p1 = scmp.eq.s32.totalorder %s110_s23, 0  ;;  %p124_p2 = scmp.eq.s32.totalorder %s1364_s19, 1 }
   0x7   : > { %p129_p3 = scmp.ne.s32.totalorder %s1305_s16, %s1301_s15  ;;  %p130_p4 = scmp.eq.s32.totalorder %s1193_s20, 1 }
   0x8   : > { %s1379_s24 = scalar_select %p111_p1, %s1309_s17, %s113_s22  }
   0x9   : > { %p1381_p5 = por %p124_p2, %p123_p0  ;;  %p1385_p6 = por %p130_p4, %p129_p3 }
   0xa   : > { %p1196_p7 = scmp.ge.s32.totalorder %s1313_s18, 1  ;;  %p166_p8 = scmp.lt.s32.totalorder %s1313_s18, 3 }
   0xc   : > { %p167_p9 = pnand %p1196_p7, %p166_p8 }
   0xd   : > { %s1198_s27 = sshll.u32 (!%p167_p9), %s1364_s19, 7  ;;  %s189_s5 = sand.u32 (!%p167_p9), 1, %s1305_s16  }
   0xe   : > { %170 = sbr.rel (%p167_p9) target bundleno = 201 (0xc9), region = 36  ;;  %p193_p10 = scmp.lt.s32.totalorder (!%p167_p9), %s1198_s27, 255 }
   0xf   : > { %s1419_s11 = sshll.u32 (!%p167_p9), %s189_s5, 10  ;;  %s1208_s30 = sshll.u32 (!%p167_p9), %s1364_s19, 14 }
  0x10   : > { %s1449_s14 = scalar_lea.vmem (!%p167_p9), [#allocation2], %s1419_s11  ;;  %s2214_s9 = scalar_lea.sflag (!%p167_p9), [#allocation3], %s189_s5 }
  0x11   : > { %s1131_s6 = sshll.u32 (!%p167_p9), %s1449_s14, 4  ;;  %s1315_s11 = smov (!%p167_p9), [#allocation2]   ;;  %s2206_s6 = int_to_ptr.vmem [resolvable:$true] %s1131_s6 }
  0x12   : > { %s1253_s10 = scalar_lea.vmem (!%p167_p9), %s2206_s6, 16384  ;;  %s1257_s12 = sshll.u32 (!%p167_p9), %s1315_s11, 4  ;;  %s1258_s12 = int_to_ptr.vmem [resolvable:$false] %s1257_s12 }
  0x13   : > { %s2266_s27 = smov (!%p193_p10, %s1198_s27), 255  ;;  %v1395_v0 = vld [vmem:[%s2255_s1] ss:$0 sm:$0xff]  ;;  %vm988_vm0 = vcmask 523264   ;;  %p1254_p11 = scmp.ne.s32.totalorder %s2206_s6, %s1253_s10 }
  0x14   : > { %s1199_s28 = sshll.u32 %s2266_s27, 3  ;;  %v1406_v1 = vld [vmem:[%s2256_s2] ss:$0 sm:$0xff]  ;;  %s1259_s13 = scalar_lea.vmem %s1258_s12, 32768 }
  0x15   : > { %s1401_s8 = scalar_lea.vmem %s2254_s0, %s1199_s28  ;;  %v1424_v11 = vld [vmem:[%s2257_s3] ss:$0 sm:$0xff]  ;;  %p1255_p12 = pnand %p1254_p11, %p1381_p5 }
  0x16   : > { %v199_v2 = vld [vmem:[%s1401_s8] sm:$0xff]  ;;  %v200_v3 = vld [vmem:[%s1401_s8 + $0x8] sm:$0xff]  ;;  %v201_v4 = vld [vmem:[%s1401_s8 + $0x10] sm:$0xff]  ;;  %p1260_p0 = scmp.lt.s32.totalorder %s2206_s6, %s1258_s12  ;;  %p1261_p1 = scmp.lt.s32.totalorder %s1259_s13, %s1253_s10 }
  0x17   : > { %v334_v5 = vmul.f32 %v1395_v0, %v199_v2  ;;  %v335_v6 = vmul.f32 %v1395_v0, %v200_v3  ;;  %v336_v7 = vmul.f32 %v1395_v0, %v201_v4  ;;  %v202_v8 = vld [vmem:[%s1401_s8 + $0x18] sm:$0xff]  ;;  %v203_v9 = vld [vmem:[%s1401_s8 + $0x20] sm:$0xff]  ;;  %v204_v10 = vld [vmem:[%s1401_s8 + $0x28] sm:$0xff]  ;;  %p1256_p13 = pneg %p1255_p12 }
  0x18   : > { %v337_v12 = vmul.f32 %v1395_v0, %v202_v8  ;;  %v338_v13 = vmul.f32 %v1395_v0, %v203_v9  ;;  %v339_v14 = vmul.f32 %v1395_v0, %v204_v10  ;;  %v205_v15 = vld [vmem:[%s1401_s8 + $0x30] sm:$0xff]  ;;  %v206_v16 = vld [vmem:[%s1401_s8 + $0x38] sm:$0xff]  ;;  %v207_v29 = vld [vmem:[%s1401_s8 + $0x40] sm:$0xff]  ;;  %p1262_p2 = por %p1261_p1, %p1260_p0 }
  0x19   : > { %v469_v17 = vadd.f32 %v1406_v1, %v334_v5  ;;  %v470_v18 = vadd.f32 %v1406_v1, %v335_v6  ;;  %v471_v19 = vadd.f32 %v1406_v1, %v336_v7  ;;  %v340_v20 = vmul.f32 %v1395_v0, %v205_v15  ;;  %v208_v33 = vld [vmem:[%s1401_s8 + $0x48] sm:$0xff]  ;;  %v209_v34 = vld [vmem:[%s1401_s8 + $0x50] sm:$0xff]  ;;  %v210_v35 = vld [vmem:[%s1401_s8 + $0x58] sm:$0xff] }
  0x1a   : > { %v472_v21 = vadd.f32 %v1406_v1, %v337_v12  ;;  %v473_v22 = vadd.f32 %v1406_v1, %v338_v13  ;;  %v474_v23 = vadd.f32 %v1406_v1, %v339_v14  ;;  %v341_v24 = vmul.f32 %v1395_v0, %v206_v16  ;;  %v211_v47 = vld [vmem:[%s1401_s8 + $0x60] sm:$0xff]  ;;  %v212_v48 = vld [vmem:[%s1401_s8 + $0x68] sm:$0xff]  ;;  %v213_v61 = vld [vmem:[%s1401_s8 + $0x70] sm:$0xff]  ;;  %p1263_p3 = pnand %p1262_p2, %p1256_p13 }
  0x1b   : > { %vm597_vm1 = vcmp.ge.f32.partialorder %v469_v17, 0.0  ;;  %v732_v25 = vmul.f32 %v1424_v11, %v469_v17  ;;  %vm598_vm2 = vcmp.ge.f32.partialorder %v470_v18, 0.0  ;;  %v733_v26 = vmul.f32 %v1424_v11, %v470_v18  ;;  %v214_v62 = vld [vmem:[%s1401_s8 + $0x78] sm:$0xff]  ;;  %v215_v7 = vld [vmem:[%s1401_s8 + $0x80] sm:$0xff]  ;;  %v216_v8 = vld [vmem:[%s1401_s8 + $0x88] sm:$0xff] }
  0x1c   : > { %vm599_vm3 = vcmp.ge.f32.partialorder %v471_v19, 0.0  ;;  %v734_v27 = vmul.f32 %v1424_v11, %v471_v19  ;;  %vm600_vm4 = vcmp.ge.f32.partialorder %v472_v21, 0.0  ;;  %v735_v28 = vmul.f32 %v1424_v11, %v472_v21  ;;  %v217_v14 = vld [vmem:[%s1401_s8 + $0x90] sm:$0xff]  ;;  %v218_v15 = vld [vmem:[%s1401_s8 + $0x98] sm:$0xff] }
  0x1d   : > { %v860_v30 = vsel %vm597_vm1, %v469_v17, %v732_v25  ;;  %v861_v31 = vsel %vm598_vm2, %v470_v18, %v733_v26  ;;  %vm601_vm5 = vcmp.ge.f32.partialorder %v473_v22, 0.0  ;;  %v736_v32 = vmul.f32 %v1424_v11, %v473_v22  ;;  %v219_v26 = vld [vmem:[%s1401_s8 + $0xa0] sm:$0xff] }
  0x1e   : > { %989 = vst.msk [vmem:[%s1449_s14] sm:$0xff] %vm988_vm0, %v860_v30  ;;  %990 = vst.msk [vmem:[%s1449_s14 + $0x8] sm:$0xff] %vm988_vm0, %v861_v31  ;;  %v862_v36 = vsel %vm599_vm3, %v471_v19, %v734_v27  ;;  %v863_v37 = vsel %vm600_vm4, %v472_v21, %v735_v28  ;;  %vm602_vm6 = vcmp.ge.f32.partialorder %v474_v23, 0.0  ;;  %v737_v38 = vmul.f32 %v1424_v11, %v474_v23  ;;  %v220_v27 = vld [vmem:[%s1401_s8 + $0xa8] sm:$0xff] }
  0x1f   : > { %991 = vst.msk [vmem:[%s1449_s14 + $0x10] sm:$0xff] %vm988_vm0, %v862_v36  ;;  %992 = vst.msk [vmem:[%s1449_s14 + $0x18] sm:$0xff] %vm988_vm0, %v863_v37  ;;  %v864_v39 = vsel %vm601_vm5, %v473_v22, %v736_v32  ;;  %v475_v40 = vadd.f32 %v1406_v1, %v340_v20  ;;  %v476_v41 = vadd.f32 %v1406_v1, %v341_v24 }
  0x20   : > { %v342_v42 = vmul.f32 %v1395_v0, %v207_v29  ;;  %993 = vst.msk [vmem:[%s1449_s14 + $0x20] sm:$0xff] %vm988_vm0, %v864_v39  ;;  %v865_v43 = vsel %vm602_vm6, %v474_v23, %v737_v38  ;;  %v343_v44 = vmul.f32 %v1395_v0, %v208_v33  ;;  %v344_v45 = vmul.f32 %v1395_v0, %v209_v34 }
  0x21   : > { %v345_v46 = vmul.f32 %v1395_v0, %v210_v35  ;;  %994 = vst.msk [vmem:[%s1449_s14 + $0x28] sm:$0xff] %vm988_vm0, %v865_v43  ;;  %vm603_vm7 = vcmp.ge.f32.partialorder %v475_v40, 0.0  ;;  %v738_v49 = vmul.f32 %v1424_v11, %v475_v40  ;;  %vm604_vm8 = vcmp.ge.f32.partialorder %v476_v41, 0.0 }
  0x22   : > { %v739_v50 = vmul.f32 %v1424_v11, %v476_v41  ;;  %v477_v51 = vadd.f32 %v1406_v1, %v342_v42  ;;  %v478_v52 = vadd.f32 %v1406_v1, %v343_v44  ;;  %v479_v53 = vadd.f32 %v1406_v1, %v344_v45 }
  0x23   : > { %v480_v54 = vadd.f32 %v1406_v1, %v345_v46  ;;  %v866_v55 = vsel %vm603_vm7, %v475_v40, %v738_v49  ;;  %v346_v57 = vmul.f32 %v1395_v0, %v211_v47  ;;  %v347_v58 = vmul.f32 %v1395_v0, %v212_v48  ;;  %v221_v40 = vld [vmem:[%s1401_s8 + $0xb0] sm:$0xff]  ;;  %v223_v48 = vld [vmem:[%s1401_s8 + $0xc0] sm:$0xff]  ;;  %v224_v49 = vld [vmem:[%s1401_s8 + $0xc8] sm:$0xff] }
  0x24   : > { %v867_v56 = vsel %vm604_vm8, %v476_v41, %v739_v50  ;;  %995 = vst.msk [vmem:[%s1449_s14 + $0x30] sm:$0xff] %vm988_vm0, %v866_v55  ;;  %vm605_vm9 = vcmp.ge.f32.partialorder %v477_v51, 0.0  ;;  %v740_v59 = vmul.f32 %v1424_v11, %v477_v51  ;;  %vm606_vm10 = vcmp.ge.f32.partialorder %v478_v52, 0.0  ;;  %v222_v41 = vld [vmem:[%s1401_s8 + $0xb8] sm:$0xff] }
  0x25   : > { %996 = vst.msk [vmem:[%s1449_s14 + $0x38] sm:$0xff] %vm988_vm0, %v867_v56  ;;  %v741_v60 = vmul.f32 %v1424_v11, %v478_v52  ;;  %vm607_vm11 = vcmp.ge.f32.partialorder %v479_v53, 0.0  ;;  %v742_v63 = vmul.f32 %v1424_v11, %v479_v53  ;;  %vm608_vm12 = vcmp.ge.f32.partialorder %v480_v54, 0.0  ;;  %v226_v55 = vld [vmem:[%s1401_s8 + $0xd8] sm:$0xff] }
  0x26   : > { %v743_v2 = vmul.f32 %v1424_v11, %v480_v54  ;;  %v868_v3 = vsel %vm605_vm9, %v477_v51, %v740_v59  ;;  %v481_v5 = vadd.f32 %v1406_v1, %v346_v57  ;;  %v482_v6 = vadd.f32 %v1406_v1, %v347_v58 }
  0x27   : > { %v869_v4 = vsel %vm606_vm10, %v478_v52, %v741_v60  ;;  %997 = vst.msk [vmem:[%s1449_s14 + $0x40] sm:$0xff] %vm988_vm0, %v868_v3  ;;  %v870_v9 = vsel %vm607_vm11, %v479_v53, %v742_v63  ;;  %v348_v12 = vmul.f32 %v1395_v0, %v213_v61  ;;  %v349_v13 = vmul.f32 %v1395_v0, %v214_v62 }
  0x28   : > { %998 = vst.msk [vmem:[%s1449_s14 + $0x48] sm:$0xff] %vm988_vm0, %v869_v4  ;;  %v871_v10 = vsel %vm608_vm12, %v480_v54, %v743_v2  ;;  %999 = vst.msk [vmem:[%s1449_s14 + $0x50] sm:$0xff] %vm988_vm0, %v870_v9  ;;  %vm609_vm13 = vcmp.ge.f32.partialorder %v481_v5, 0.0  ;;  %v744_v16 = vmul.f32 %v1424_v11, %v481_v5  ;;  %vm610_vm14 = vcmp.ge.f32.partialorder %v482_v6, 0.0  ;;  %v225_v54 = vld [vmem:[%s1401_s8 + $0xd0] sm:$0xff]  ;;  %v227_v4 = vld [vmem:[%s1401_s8 + $0xe0] sm:$0xff] }
  0x29   : > { %1000 = vst.msk [vmem:[%s1449_s14 + $0x58] sm:$0xff] %vm988_vm0, %v871_v10  ;;  %v745_v17 = vmul.f32 %v1424_v11, %v482_v6  ;;  %v483_v18 = vadd.f32 %v1406_v1, %v348_v12  ;;  %v484_v19 = vadd.f32 %v1406_v1, %v349_v13  ;;  %v350_v20 = vmul.f32 %v1395_v0, %v215_v7 }
  0x2a   : > { %v351_v21 = vmul.f32 %v1395_v0, %v216_v8  ;;  %v872_v22 = vsel %vm609_vm13, %v481_v5, %v744_v16  ;;  %v352_v24 = vmul.f32 %v1395_v0, %v217_v14  ;;  %v353_v25 = vmul.f32 %v1395_v0, %v218_v15  ;;  %v228_v5 = vld [vmem:[%s1401_s8 + $0xe8] sm:$0xff] }
  0x2b   : > { %v873_v23 = vsel %vm610_vm14, %v482_v6, %v745_v17  ;;  %1001 = vst.msk [vmem:[%s1449_s14 + $0x60] sm:$0xff] %vm988_vm0, %v872_v22  ;;  %vm611_vm15 = vcmp.ge.f32.partialorder %v483_v18, 0.0  ;;  %v746_v28 = vmul.f32 %v1424_v11, %v483_v18  ;;  %vm612_vm1 = vcmp.ge.f32.partialorder %v484_v19, 0.0 }
  0x2c   : > { %1002 = vst.msk [vmem:[%s1449_s14 + $0x68] sm:$0xff] %vm988_vm0, %v873_v23  ;;  %v747_v29 = vmul.f32 %v1424_v11, %v484_v19  ;;  %v485_v30 = vadd.f32 %v1406_v1, %v350_v20  ;;  %v486_v31 = vadd.f32 %v1406_v1, %v351_v21  ;;  %v487_v32 = vadd.f32 %v1406_v1, %v352_v24  ;;  %v230_v20 = vld [vmem:[%s1401_s8 + $0xf8] sm:$0xff] }
  0x2d   : > { %v488_v33 = vadd.f32 %v1406_v1, %v353_v25  ;;  %v874_v34 = vsel %vm611_vm15, %v483_v18, %v746_v28  ;;  %v354_v36 = vmul.f32 %v1395_v0, %v219_v26  ;;  %v355_v37 = vmul.f32 %v1395_v0, %v220_v27  ;;  %v231_v27 = vld [vmem:[%s1401_s8 + $0x100] sm:$0xff]  ;;  %v232_v28 = vld [vmem:[%s1401_s8 + $0x108] sm:$0xff] }
  0x2e   : > { %v875_v35 = vsel %vm612_vm1, %v484_v19, %v747_v29  ;;  %1003 = vst.msk [vmem:[%s1449_s14 + $0x70] sm:$0xff] %vm988_vm0, %v874_v34  ;;  %vm613_vm2 = vcmp.ge.f32.partialorder %v485_v30, 0.0  ;;  %v748_v38 = vmul.f32 %v1424_v11, %v485_v30  ;;  %vm614_vm3 = vcmp.ge.f32.partialorder %v486_v31, 0.0  ;;  %v229_v19 = vld [vmem:[%s1401_s8 + $0xf0] sm:$0xff]  ;;  %v234_v34 = vld [vmem:[%s1401_s8 + $0x118] sm:$0xff] }
  0x2f   : > { %1004 = vst.msk [vmem:[%s1449_s14 + $0x78] sm:$0xff] %vm988_vm0, %v875_v35  ;;  %v749_v39 = vmul.f32 %v1424_v11, %v486_v31  ;;  %vm615_vm4 = vcmp.ge.f32.partialorder %v487_v32, 0.0  ;;  %v750_v42 = vmul.f32 %v1424_v11, %v487_v32  ;;  %vm616_vm5 = vcmp.ge.f32.partialorder %v488_v33, 0.0 }
  0x30   : > { %v751_v43 = vmul.f32 %v1424_v11, %v488_v33  ;;  %v876_v44 = vsel %vm613_vm2, %v485_v30, %v748_v38  ;;  %v489_v46 = vadd.f32 %v1406_v1, %v354_v36  ;;  %v490_v47 = vadd.f32 %v1406_v1, %v355_v37 }
  0x31   : > { %v877_v45 = vsel %vm614_vm3, %v486_v31, %v749_v39  ;;  %1005 = vst.msk [vmem:[%s1449_s14 + $0x80] sm:$0xff] %vm988_vm0, %v876_v44  ;;  %v878_v50 = vsel %vm615_vm4, %v487_v32, %v750_v42  ;;  %v356_v52 = vmul.f32 %v1395_v0, %v221_v40  ;;  %v357_v53 = vmul.f32 %v1395_v0, %v222_v41 }
  0x32   : > { %1006 = vst.msk [vmem:[%s1449_s14 + $0x88] sm:$0xff] %vm988_vm0, %v877_v45  ;;  %v879_v51 = vsel %vm616_vm5, %v488_v33, %v751_v43  ;;  %1007 = vst.msk [vmem:[%s1449_s14 + $0x90] sm:$0xff] %vm988_vm0, %v878_v50  ;;  %vm617_vm6 = vcmp.ge.f32.partialorder %v489_v46, 0.0  ;;  %v752_v56 = vmul.f32 %v1424_v11, %v489_v46  ;;  %vm618_vm7 = vcmp.ge.f32.partialorder %v490_v47, 0.0  ;;  %v233_v33 = vld [vmem:[%s1401_s8 + $0x110] sm:$0xff]  ;;  %v235_v45 = vld [vmem:[%s1401_s8 + $0x120] sm:$0xff] }
  0x33   : > { %1008 = vst.msk [vmem:[%s1449_s14 + $0x98] sm:$0xff] %vm988_vm0, %v879_v51  ;;  %v753_v57 = vmul.f32 %v1424_v11, %v490_v47  ;;  %v491_v58 = vadd.f32 %v1406_v1, %v356_v52  ;;  %v492_v59 = vadd.f32 %v1406_v1, %v357_v53  ;;  %v358_v60 = vmul.f32 %v1395_v0, %v223_v48 }
  0x34   : > { %v359_v61 = vmul.f32 %v1395_v0, %v224_v49  ;;  %v880_v62 = vsel %vm617_vm6, %v489_v46, %v752_v56  ;;  %v360_v2 = vmul.f32 %v1395_v0, %v225_v54  ;;  %v361_v3 = vmul.f32 %v1395_v0, %v226_v55  ;;  %v236_v46 = vld [vmem:[%s1401_s8 + $0x128] sm:$0xff] }
  0x35   : > { %v881_v63 = vsel %vm618_vm7, %v490_v47, %v753_v57  ;;  %1009 = vst.msk [vmem:[%s1449_s14 + $0xa0] sm:$0xff] %vm988_vm0, %v880_v62  ;;  %vm619_vm8 = vcmp.ge.f32.partialorder %v491_v58, 0.0  ;;  %v754_v6 = vmul.f32 %v1424_v11, %v491_v58  ;;  %vm620_vm9 = vcmp.ge.f32.partialorder %v492_v59, 0.0 }
  0x36   : > { %1010 = vst.msk [vmem:[%s1449_s14 + $0xa8] sm:$0xff] %vm988_vm0, %v881_v63  ;;  %v755_v7 = vmul.f32 %v1424_v11, %v492_v59  ;;  %v493_v8 = vadd.f32 %v1406_v1, %v358_v60  ;;  %v494_v9 = vadd.f32 %v1406_v1, %v359_v61  ;;  %v495_v10 = vadd.f32 %v1406_v1, %v360_v2  ;;  %v238_v60 = vld [vmem:[%s1401_s8 + $0x138] sm:$0xff] }
  0x37   : > { %v496_v12 = vadd.f32 %v1406_v1, %v361_v3  ;;  %v882_v13 = vsel %vm619_vm8, %v491_v58, %v754_v6  ;;  %v362_v15 = vmul.f32 %v1395_v0, %v227_v4  ;;  %v363_v16 = vmul.f32 %v1395_v0, %v228_v5  ;;  %v239_v5 = vld [vmem:[%s1401_s8 + $0x140] sm:$0xff]  ;;  %v240_v6 = vld [vmem:[%s1401_s8 + $0x148] sm:$0xff] }
  0x38   : > { %v883_v14 = vsel %vm620_vm9, %v492_v59, %v755_v7  ;;  %1011 = vst.msk [vmem:[%s1449_s14 + $0xb0] sm:$0xff] %vm988_vm0, %v882_v13  ;;  %vm621_vm10 = vcmp.ge.f32.partialorder %v493_v8, 0.0  ;;  %v756_v17 = vmul.f32 %v1424_v11, %v493_v8  ;;  %vm622_vm11 = vcmp.ge.f32.partialorder %v494_v9, 0.0  ;;  %v237_v59 = vld [vmem:[%s1401_s8 + $0x130] sm:$0xff]  ;;  %v242_v13 = vld [vmem:[%s1401_s8 + $0x158] sm:$0xff] }
  0x39   : > { %1012 = vst.msk [vmem:[%s1449_s14 + $0xb8] sm:$0xff] %vm988_vm0, %v883_v14  ;;  %v757_v18 = vmul.f32 %v1424_v11, %v494_v9  ;;  %vm623_vm12 = vcmp.ge.f32.partialorder %v495_v10, 0.0  ;;  %v758_v21 = vmul.f32 %v1424_v11, %v495_v10  ;;  %vm624_vm13 = vcmp.ge.f32.partialorder %v496_v12, 0.0 }
  0x3a   : > { %v759_v22 = vmul.f32 %v1424_v11, %v496_v12  ;;  %v884_v23 = vsel %vm621_vm10, %v493_v8, %v756_v17  ;;  %v497_v25 = vadd.f32 %v1406_v1, %v362_v15  ;;  %v498_v26 = vadd.f32 %v1406_v1, %v363_v16 }
  0x3b   : > { %v885_v24 = vsel %vm622_vm11, %v494_v9, %v757_v18  ;;  %1013 = vst.msk [vmem:[%s1449_s14 + $0xc0] sm:$0xff] %vm988_vm0, %v884_v23  ;;  %v886_v29 = vsel %vm623_vm12, %v495_v10, %v758_v21  ;;  %v364_v31 = vmul.f32 %v1395_v0, %v229_v19  ;;  %v365_v32 = vmul.f32 %v1395_v0, %v230_v20 }
  0x3c   : > { %1014 = vst.msk [vmem:[%s1449_s14 + $0xc8] sm:$0xff] %vm988_vm0, %v885_v24  ;;  %v887_v30 = vsel %vm624_vm13, %v496_v12, %v759_v22  ;;  %1015 = vst.msk [vmem:[%s1449_s14 + $0xd0] sm:$0xff] %vm988_vm0, %v886_v29  ;;  %vm625_vm14 = vcmp.ge.f32.partialorder %v497_v25, 0.0  ;;  %v760_v35 = vmul.f32 %v1424_v11, %v497_v25  ;;  %vm626_vm15 = vcmp.ge.f32.partialorder %v498_v26, 0.0  ;;  %v241_v12 = vld [vmem:[%s1401_s8 + $0x150] sm:$0xff]  ;;  %v243_v24 = vld [vmem:[%s1401_s8 + $0x160] sm:$0xff] }
  0x3d   : > { %1016 = vst.msk [vmem:[%s1449_s14 + $0xd8] sm:$0xff] %vm988_vm0, %v887_v30  ;;  %v761_v36 = vmul.f32 %v1424_v11, %v498_v26  ;;  %v499_v37 = vadd.f32 %v1406_v1, %v364_v31  ;;  %v500_v38 = vadd.f32 %v1406_v1, %v365_v32  ;;  %v366_v39 = vmul.f32 %v1395_v0, %v231_v27 }
  0x3e   : > { %v367_v40 = vmul.f32 %v1395_v0, %v232_v28  ;;  %v888_v41 = vsel %vm625_vm14, %v497_v25, %v760_v35  ;;  %v368_v43 = vmul.f32 %v1395_v0, %v233_v33  ;;  %v369_v44 = vmul.f32 %v1395_v0, %v234_v34  ;;  %v244_v25 = vld [vmem:[%s1401_s8 + $0x168] sm:$0xff] }
  0x3f   : > { %v889_v42 = vsel %vm626_vm15, %v498_v26, %v761_v36  ;;  %1017 = vst.msk [vmem:[%s1449_s14 + $0xe0] sm:$0xff] %vm988_vm0, %v888_v41  ;;  %vm627_vm1 = vcmp.ge.f32.partialorder %v499_v37, 0.0  ;;  %v762_v47 = vmul.f32 %v1424_v11, %v499_v37  ;;  %vm628_vm2 = vcmp.ge.f32.partialorder %v500_v38, 0.0 }
  0x40   : > { %1018 = vst.msk [vmem:[%s1449_s14 + $0xe8] sm:$0xff] %vm988_vm0, %v889_v42  ;;  %v763_v48 = vmul.f32 %v1424_v11, %v500_v38  ;;  %v501_v49 = vadd.f32 %v1406_v1, %v366_v39  ;;  %v502_v50 = vadd.f32 %v1406_v1, %v367_v40  ;;  %v503_v51 = vadd.f32 %v1406_v1, %v368_v43  ;;  %v246_v39 = vld [vmem:[%s1401_s8 + $0x178] sm:$0xff] }
  0x41   : > { %v504_v52 = vadd.f32 %v1406_v1, %v369_v44  ;;  %v890_v53 = vsel %vm627_vm1, %v499_v37, %v762_v47  ;;  %v370_v55 = vmul.f32 %v1395_v0, %v235_v45  ;;  %v371_v56 = vmul.f32 %v1395_v0, %v236_v46  ;;  %v247_v46 = vld [vmem:[%s1401_s8 + $0x180] sm:$0xff]  ;;  %v248_v47 = vld [vmem:[%s1401_s8 + $0x188] sm:$0xff] }
  0x42   : > { %v891_v54 = vsel %vm628_vm2, %v500_v38, %v763_v48  ;;  %1019 = vst.msk [vmem:[%s1449_s14 + $0xf0] sm:$0xff] %vm988_vm0, %v890_v53  ;;  %vm629_vm3 = vcmp.ge.f32.partialorder %v501_v49, 0.0  ;;  %v764_v57 = vmul.f32 %v1424_v11, %v501_v49  ;;  %vm630_vm4 = vcmp.ge.f32.partialorder %v502_v50, 0.0  ;;  %v245_v38 = vld [vmem:[%s1401_s8 + $0x170] sm:$0xff]  ;;  %v250_v53 = vld [vmem:[%s1401_s8 + $0x198] sm:$0xff] }
  0x43   : > { %1020 = vst.msk [vmem:[%s1449_s14 + $0xf8] sm:$0xff] %vm988_vm0, %v891_v54  ;;  %v765_v58 = vmul.f32 %v1424_v11, %v502_v50  ;;  %vm631_vm5 = vcmp.ge.f32.partialorder %v503_v51, 0.0  ;;  %v766_v61 = vmul.f32 %v1424_v11, %v503_v51  ;;  %vm632_vm6 = vcmp.ge.f32.partialorder %v504_v52, 0.0 }
  0x44   : > { %v767_v62 = vmul.f32 %v1424_v11, %v504_v52  ;;  %v892_v63 = vsel %vm629_vm3, %v501_v49, %v764_v57  ;;  %v505_v3 = vadd.f32 %v1406_v1, %v370_v55  ;;  %v506_v4 = vadd.f32 %v1406_v1, %v371_v56 }
  0x45   : > { %v893_v2 = vsel %vm630_vm4, %v502_v50, %v765_v58  ;;  %1021 = vst.msk [vmem:[%s1449_s14 + $0x100] sm:$0xff] %vm988_vm0, %v892_v63  ;;  %v894_v7 = vsel %vm631_vm5, %v503_v51, %v766_v61  ;;  %v372_v9 = vmul.f32 %v1395_v0, %v237_v59  ;;  %v373_v10 = vmul.f32 %v1395_v0, %v238_v60 }
  0x46   : > { %1022 = vst.msk [vmem:[%s1449_s14 + $0x108] sm:$0xff] %vm988_vm0, %v893_v2  ;;  %v895_v8 = vsel %vm632_vm6, %v504_v52, %v767_v62  ;;  %1023 = vst.msk [vmem:[%s1449_s14 + $0x110] sm:$0xff] %vm988_vm0, %v894_v7  ;;  %vm633_vm7 = vcmp.ge.f32.partialorder %v505_v3, 0.0  ;;  %v768_v14 = vmul.f32 %v1424_v11, %v505_v3  ;;  %vm634_vm8 = vcmp.ge.f32.partialorder %v506_v4, 0.0  ;;  %v249_v52 = vld [vmem:[%s1401_s8 + $0x190] sm:$0xff]  ;;  %v251_v2 = vld [vmem:[%s1401_s8 + $0x1a0] sm:$0xff] }
  0x47   : > { %1024 = vst.msk [vmem:[%s1449_s14 + $0x118] sm:$0xff] %vm988_vm0, %v895_v8  ;;  %v769_v15 = vmul.f32 %v1424_v11, %v506_v4  ;;  %v507_v16 = vadd.f32 %v1406_v1, %v372_v9  ;;  %v508_v17 = vadd.f32 %v1406_v1, %v373_v10  ;;  %v374_v18 = vmul.f32 %v1395_v0, %v239_v5 }
  0x48   : > { %v375_v19 = vmul.f32 %v1395_v0, %v240_v6  ;;  %v896_v20 = vsel %vm633_vm7, %v505_v3, %v768_v14  ;;  %v376_v22 = vmul.f32 %v1395_v0, %v241_v12  ;;  %v377_v23 = vmul.f32 %v1395_v0, %v242_v13  ;;  %v252_v3 = vld [vmem:[%s1401_s8 + $0x1a8] sm:$0xff] }
  0x49   : > { %v897_v21 = vsel %vm634_vm8, %v506_v4, %v769_v15  ;;  %1025 = vst.msk [vmem:[%s1449_s14 + $0x120] sm:$0xff] %vm988_vm0, %v896_v20  ;;  %vm635_vm9 = vcmp.ge.f32.partialorder %v507_v16, 0.0  ;;  %v770_v26 = vmul.f32 %v1424_v11, %v507_v16  ;;  %vm636_vm10 = vcmp.ge.f32.partialorder %v508_v17, 0.0 }
  0x4a   : > { %1026 = vst.msk [vmem:[%s1449_s14 + $0x128] sm:$0xff] %vm988_vm0, %v897_v21  ;;  %v771_v27 = vmul.f32 %v1424_v11, %v508_v17  ;;  %v509_v28 = vadd.f32 %v1406_v1, %v374_v18  ;;  %v510_v29 = vadd.f32 %v1406_v1, %v375_v19  ;;  %v511_v30 = vadd.f32 %v1406_v1, %v376_v22  ;;  %v254_v18 = vld [vmem:[%s1401_s8 + $0x1b8] sm:$0xff] }
  0x4b   : > { %v512_v31 = vadd.f32 %v1406_v1, %v377_v23  ;;  %v898_v32 = vsel %vm635_vm9, %v507_v16, %v770_v26  ;;  %v378_v34 = vmul.f32 %v1395_v0, %v243_v24  ;;  %v379_v35 = vmul.f32 %v1395_v0, %v244_v25  ;;  %v255_v25 = vld [vmem:[%s1401_s8 + $0x1c0] sm:$0xff]  ;;  %v256_v26 = vld [vmem:[%s1401_s8 + $0x1c8] sm:$0xff] }
  0x4c   : > { %v899_v33 = vsel %vm636_vm10, %v508_v17, %v771_v27  ;;  %1027 = vst.msk [vmem:[%s1449_s14 + $0x130] sm:$0xff] %vm988_vm0, %v898_v32  ;;  %vm637_vm11 = vcmp.ge.f32.partialorder %v509_v28, 0.0  ;;  %v772_v36 = vmul.f32 %v1424_v11, %v509_v28  ;;  %vm638_vm12 = vcmp.ge.f32.partialorder %v510_v29, 0.0  ;;  %v253_v17 = vld [vmem:[%s1401_s8 + $0x1b0] sm:$0xff]  ;;  %v258_v32 = vld [vmem:[%s1401_s8 + $0x1d8] sm:$0xff] }
  0x4d   : > { %1028 = vst.msk [vmem:[%s1449_s14 + $0x138] sm:$0xff] %vm988_vm0, %v899_v33  ;;  %v773_v37 = vmul.f32 %v1424_v11, %v510_v29  ;;  %vm639_vm13 = vcmp.ge.f32.partialorder %v511_v30, 0.0  ;;  %v774_v40 = vmul.f32 %v1424_v11, %v511_v30  ;;  %vm640_vm14 = vcmp.ge.f32.partialorder %v512_v31, 0.0 }
  0x4e   : > { %v775_v41 = vmul.f32 %v1424_v11, %v512_v31  ;;  %v900_v42 = vsel %vm637_vm11, %v509_v28, %v772_v36  ;;  %v513_v44 = vadd.f32 %v1406_v1, %v378_v34  ;;  %v514_v45 = vadd.f32 %v1406_v1, %v379_v35 }
  0x4f   : > { %v901_v43 = vsel %vm638_vm12, %v510_v29, %v773_v37  ;;  %1029 = vst.msk [vmem:[%s1449_s14 + $0x140] sm:$0xff] %vm988_vm0, %v900_v42  ;;  %v902_v48 = vsel %vm639_vm13, %v511_v30, %v774_v40  ;;  %v380_v50 = vmul.f32 %v1395_v0, %v245_v38  ;;  %v381_v51 = vmul.f32 %v1395_v0, %v246_v39 }
  0x50   : > { %1030 = vst.msk [vmem:[%s1449_s14 + $0x148] sm:$0xff] %vm988_vm0, %v901_v43  ;;  %v903_v49 = vsel %vm640_vm14, %v512_v31, %v775_v41  ;;  %1031 = vst.msk [vmem:[%s1449_s14 + $0x150] sm:$0xff] %vm988_vm0, %v902_v48  ;;  %vm641_vm15 = vcmp.ge.f32.partialorder %v513_v44, 0.0  ;;  %v776_v54 = vmul.f32 %v1424_v11, %v513_v44  ;;  %vm642_vm1 = vcmp.ge.f32.partialorder %v514_v45, 0.0  ;;  %v257_v31 = vld [vmem:[%s1401_s8 + $0x1d0] sm:$0xff]  ;;  %v259_v43 = vld [vmem:[%s1401_s8 + $0x1e0] sm:$0xff] }
  0x51   : > { %1032 = vst.msk [vmem:[%s1449_s14 + $0x158] sm:$0xff] %vm988_vm0, %v903_v49  ;;  %v777_v55 = vmul.f32 %v1424_v11, %v514_v45  ;;  %v515_v56 = vadd.f32 %v1406_v1, %v380_v50  ;;  %v516_v57 = vadd.f32 %v1406_v1, %v381_v51  ;;  %v382_v58 = vmul.f32 %v1395_v0, %v247_v46 }
  0x52   : > { %v383_v59 = vmul.f32 %v1395_v0, %v248_v47  ;;  %v904_v60 = vsel %vm641_vm15, %v513_v44, %v776_v54  ;;  %v384_v62 = vmul.f32 %v1395_v0, %v249_v52  ;;  %v385_v63 = vmul.f32 %v1395_v0, %v250_v53  ;;  %v260_v44 = vld [vmem:[%s1401_s8 + $0x1e8] sm:$0xff] }
  0x53   : > { %v905_v61 = vsel %vm642_vm1, %v514_v45, %v777_v55  ;;  %1033 = vst.msk [vmem:[%s1449_s14 + $0x160] sm:$0xff] %vm988_vm0, %v904_v60  ;;  %vm643_vm2 = vcmp.ge.f32.partialorder %v515_v56, 0.0  ;;  %v778_v4 = vmul.f32 %v1424_v11, %v515_v56  ;;  %vm644_vm3 = vcmp.ge.f32.partialorder %v516_v57, 0.0 }
  0x54   : > { %1034 = vst.msk [vmem:[%s1449_s14 + $0x168] sm:$0xff] %vm988_vm0, %v905_v61  ;;  %v779_v5 = vmul.f32 %v1424_v11, %v516_v57  ;;  %v517_v6 = vadd.f32 %v1406_v1, %v382_v58  ;;  %v518_v7 = vadd.f32 %v1406_v1, %v383_v59  ;;  %v519_v8 = vadd.f32 %v1406_v1, %v384_v62  ;;  %v262_v58 = vld [vmem:[%s1401_s8 + $0x1f8] sm:$0xff] }
  0x55   : > { %v520_v9 = vadd.f32 %v1406_v1, %v385_v63  ;;  %v906_v10 = vsel %vm643_vm2, %v515_v56, %v778_v4  ;;  %v386_v13 = vmul.f32 %v1395_v0, %v251_v2  ;;  %v387_v14 = vmul.f32 %v1395_v0, %v252_v3  ;;  %v263_v3 = vld [vmem:[%s1401_s8 + $0x200] sm:$0xff]  ;;  %v264_v4 = vld [vmem:[%s1401_s8 + $0x208] sm:$0xff] }
  0x56   : > { %v907_v12 = vsel %vm644_vm3, %v516_v57, %v779_v5  ;;  %1035 = vst.msk [vmem:[%s1449_s14 + $0x170] sm:$0xff] %vm988_vm0, %v906_v10  ;;  %vm645_vm4 = vcmp.ge.f32.partialorder %v517_v6, 0.0  ;;  %v780_v15 = vmul.f32 %v1424_v11, %v517_v6  ;;  %vm646_vm5 = vcmp.ge.f32.partialorder %v518_v7, 0.0  ;;  %v261_v57 = vld [vmem:[%s1401_s8 + $0x1f0] sm:$0xff]  ;;  %v266_v10 = vld [vmem:[%s1401_s8 + $0x218] sm:$0xff] }
  0x57   : > { %1036 = vst.msk [vmem:[%s1449_s14 + $0x178] sm:$0xff] %vm988_vm0, %v907_v12  ;;  %v781_v16 = vmul.f32 %v1424_v11, %v518_v7  ;;  %vm647_vm6 = vcmp.ge.f32.partialorder %v519_v8, 0.0  ;;  %v782_v19 = vmul.f32 %v1424_v11, %v519_v8  ;;  %vm648_vm7 = vcmp.ge.f32.partialorder %v520_v9, 0.0 }
  0x58   : > { %v783_v20 = vmul.f32 %v1424_v11, %v520_v9  ;;  %v908_v21 = vsel %vm645_vm4, %v517_v6, %v780_v15  ;;  %v521_v23 = vadd.f32 %v1406_v1, %v386_v13  ;;  %v522_v24 = vadd.f32 %v1406_v1, %v387_v14 }
  0x59   : > { %v909_v22 = vsel %vm646_vm5, %v518_v7, %v781_v16  ;;  %1037 = vst.msk [vmem:[%s1449_s14 + $0x180] sm:$0xff] %vm988_vm0, %v908_v21  ;;  %v910_v27 = vsel %vm647_vm6, %v519_v8, %v782_v19  ;;  %v388_v29 = vmul.f32 %v1395_v0, %v253_v17  ;;  %v389_v30 = vmul.f32 %v1395_v0, %v254_v18 }
  0x5a   : > { %1038 = vst.msk [vmem:[%s1449_s14 + $0x188] sm:$0xff] %vm988_vm0, %v909_v22  ;;  %v911_v28 = vsel %vm648_vm7, %v520_v9, %v783_v20  ;;  %1039 = vst.msk [vmem:[%s1449_s14 + $0x190] sm:$0xff] %vm988_vm0, %v910_v27  ;;  %vm649_vm8 = vcmp.ge.f32.partialorder %v521_v23, 0.0  ;;  %v784_v33 = vmul.f32 %v1424_v11, %v521_v23  ;;  %vm650_vm9 = vcmp.ge.f32.partialorder %v522_v24, 0.0  ;;  %v265_v9 = vld [vmem:[%s1401_s8 + $0x210] sm:$0xff]  ;;  %v267_v22 = vld [vmem:[%s1401_s8 + $0x220] sm:$0xff] }
  0x5b   : > { %1040 = vst.msk [vmem:[%s1449_s14 + $0x198] sm:$0xff] %vm988_vm0, %v911_v28  ;;  %v785_v34 = vmul.f32 %v1424_v11, %v522_v24  ;;  %v523_v35 = vadd.f32 %v1406_v1, %v388_v29  ;;  %v524_v36 = vadd.f32 %v1406_v1, %v389_v30  ;;  %v390_v37 = vmul.f32 %v1395_v0, %v255_v25 }
  0x5c   : > { %v391_v38 = vmul.f32 %v1395_v0, %v256_v26  ;;  %v912_v39 = vsel %vm649_vm8, %v521_v23, %v784_v33  ;;  %v392_v41 = vmul.f32 %v1395_v0, %v257_v31  ;;  %v393_v42 = vmul.f32 %v1395_v0, %v258_v32  ;;  %v268_v23 = vld [vmem:[%s1401_s8 + $0x228] sm:$0xff] }
  0x5d   : > { %v913_v40 = vsel %vm650_vm9, %v522_v24, %v785_v34  ;;  %1041 = vst.msk [vmem:[%s1449_s14 + $0x1a0] sm:$0xff] %vm988_vm0, %v912_v39  ;;  %vm651_vm10 = vcmp.ge.f32.partialorder %v523_v35, 0.0  ;;  %v786_v45 = vmul.f32 %v1424_v11, %v523_v35  ;;  %vm652_vm11 = vcmp.ge.f32.partialorder %v524_v36, 0.0 }
  0x5e   : > { %1042 = vst.msk [vmem:[%s1449_s14 + $0x1a8] sm:$0xff] %vm988_vm0, %v913_v40  ;;  %v787_v46 = vmul.f32 %v1424_v11, %v524_v36  ;;  %v525_v47 = vadd.f32 %v1406_v1, %v390_v37  ;;  %v526_v48 = vadd.f32 %v1406_v1, %v391_v38  ;;  %v527_v49 = vadd.f32 %v1406_v1, %v392_v41  ;;  %v270_v37 = vld [vmem:[%s1401_s8 + $0x238] sm:$0xff] }
  0x5f   : > { %v528_v50 = vadd.f32 %v1406_v1, %v393_v42  ;;  %v914_v51 = vsel %vm651_vm10, %v523_v35, %v786_v45  ;;  %v394_v53 = vmul.f32 %v1395_v0, %v259_v43  ;;  %v395_v54 = vmul.f32 %v1395_v0, %v260_v44  ;;  %v271_v44 = vld [vmem:[%s1401_s8 + $0x240] sm:$0xff]  ;;  %v272_v45 = vld [vmem:[%s1401_s8 + $0x248] sm:$0xff] }
  0x60   : > { %v915_v52 = vsel %vm652_vm11, %v524_v36, %v787_v46  ;;  %1043 = vst.msk [vmem:[%s1449_s14 + $0x1b0] sm:$0xff] %vm988_vm0, %v914_v51  ;;  %vm653_vm12 = vcmp.ge.f32.partialorder %v525_v47, 0.0  ;;  %v788_v55 = vmul.f32 %v1424_v11, %v525_v47  ;;  %vm654_vm13 = vcmp.ge.f32.partialorder %v526_v48, 0.0  ;;  %v269_v36 = vld [vmem:[%s1401_s8 + $0x230] sm:$0xff]  ;;  %v274_v51 = vld [vmem:[%s1401_s8 + $0x258] sm:$0xff] }
  0x61   : > { %1044 = vst.msk [vmem:[%s1449_s14 + $0x1b8] sm:$0xff] %vm988_vm0, %v915_v52  ;;  %v789_v56 = vmul.f32 %v1424_v11, %v526_v48  ;;  %vm655_vm14 = vcmp.ge.f32.partialorder %v527_v49, 0.0  ;;  %v790_v59 = vmul.f32 %v1424_v11, %v527_v49  ;;  %vm656_vm15 = vcmp.ge.f32.partialorder %v528_v50, 0.0 }
  0x62   : > { %v791_v60 = vmul.f32 %v1424_v11, %v528_v50  ;;  %v916_v61 = vsel %vm653_vm12, %v525_v47, %v788_v55  ;;  %v529_v63 = vadd.f32 %v1406_v1, %v394_v53  ;;  %v530_v2 = vadd.f32 %v1406_v1, %v395_v54 }
  0x63   : > { %v917_v62 = vsel %vm654_vm13, %v526_v48, %v789_v56  ;;  %1045 = vst.msk [vmem:[%s1449_s14 + $0x1c0] sm:$0xff] %vm988_vm0, %v916_v61  ;;  %v918_v5 = vsel %vm655_vm14, %v527_v49, %v790_v59  ;;  %v396_v7 = vmul.f32 %v1395_v0, %v261_v57  ;;  %v397_v8 = vmul.f32 %v1395_v0, %v262_v58 }
  0x64   : > { %1046 = vst.msk [vmem:[%s1449_s14 + $0x1c8] sm:$0xff] %vm988_vm0, %v917_v62  ;;  %v919_v6 = vsel %vm656_vm15, %v528_v50, %v791_v60  ;;  %1047 = vst.msk [vmem:[%s1449_s14 + $0x1d0] sm:$0xff] %vm988_vm0, %v918_v5  ;;  %vm657_vm1 = vcmp.ge.f32.partialorder %v529_v63, 0.0  ;;  %v792_v12 = vmul.f32 %v1424_v11, %v529_v63  ;;  %vm658_vm2 = vcmp.ge.f32.partialorder %v530_v2, 0.0  ;;  %v273_v50 = vld [vmem:[%s1401_s8 + $0x250] sm:$0xff]  ;;  %v275_v62 = vld [vmem:[%s1401_s8 + $0x260] sm:$0xff] }
  0x65   : > { %1048 = vst.msk [vmem:[%s1449_s14 + $0x1d8] sm:$0xff] %vm988_vm0, %v919_v6  ;;  %v793_v13 = vmul.f32 %v1424_v11, %v530_v2  ;;  %v531_v14 = vadd.f32 %v1406_v1, %v396_v7  ;;  %v532_v15 = vadd.f32 %v1406_v1, %v397_v8  ;;  %v398_v16 = vmul.f32 %v1395_v0, %v263_v3  ;;  %v1861_v3 = vld [vmem:[%s2256_s2] ss:$0 sm:$0xff] }
  0x66   : > { %v399_v17 = vmul.f32 %v1395_v0, %v264_v4  ;;  %v920_v18 = vsel %vm657_vm1, %v529_v63, %v792_v12  ;;  %v400_v20 = vmul.f32 %v1395_v0, %v265_v9  ;;  %v401_v21 = vmul.f32 %v1395_v0, %v266_v10  ;;  %v276_v63 = vld [vmem:[%s1401_s8 + $0x268] sm:$0xff]  ;;  %v1881_v12 = vld [vmem:[%s2257_s3] ss:$0 sm:$0xff] }
  0x67   : > { %v921_v19 = vsel %vm658_vm2, %v530_v2, %v793_v13  ;;  %1049 = vst.msk [vmem:[%s1449_s14 + $0x1e0] sm:$0xff] %vm988_vm0, %v920_v18  ;;  %vm659_vm3 = vcmp.ge.f32.partialorder %v531_v14, 0.0  ;;  %v794_v24 = vmul.f32 %v1424_v11, %v531_v14  ;;  %vm660_vm4 = vcmp.ge.f32.partialorder %v532_v15, 0.0 }
  0x68   : > { %1050 = vst.msk [vmem:[%s1449_s14 + $0x1e8] sm:$0xff] %vm988_vm0, %v921_v19  ;;  %v795_v25 = vmul.f32 %v1424_v11, %v532_v15  ;;  %v533_v26 = vadd.f32 %v1406_v1, %v398_v16  ;;  %v534_v27 = vadd.f32 %v1406_v1, %v399_v17  ;;  %v535_v28 = vadd.f32 %v1406_v1, %v400_v20  ;;  %v278_v16 = vld [vmem:[%s1401_s8 + $0x278] sm:$0xff] }
  0x69   : > { %v536_v29 = vadd.f32 %v1406_v1, %v401_v21  ;;  %v922_v30 = vsel %vm659_vm3, %v531_v14, %v794_v24  ;;  %v402_v32 = vmul.f32 %v1395_v0, %v267_v22  ;;  %v403_v33 = vmul.f32 %v1395_v0, %v268_v23  ;;  %v279_v23 = vld [vmem:[%s1401_s8 + $0x280] sm:$0xff]  ;;  %v280_v24 = vld [vmem:[%s1401_s8 + $0x288] sm:$0xff] }
  0x6a   : > { %v923_v31 = vsel %vm660_vm4, %v532_v15, %v795_v25  ;;  %1051 = vst.msk [vmem:[%s1449_s14 + $0x1f0] sm:$0xff] %vm988_vm0, %v922_v30  ;;  %vm661_vm5 = vcmp.ge.f32.partialorder %v533_v26, 0.0  ;;  %v796_v34 = vmul.f32 %v1424_v11, %v533_v26  ;;  %vm662_vm6 = vcmp.ge.f32.partialorder %v534_v27, 0.0  ;;  %v277_v15 = vld [vmem:[%s1401_s8 + $0x270] sm:$0xff]  ;;  %v282_v30 = vld [vmem:[%s1401_s8 + $0x298] sm:$0xff] }
  0x6b   : > { %1052 = vst.msk [vmem:[%s1449_s14 + $0x1f8] sm:$0xff] %vm988_vm0, %v923_v31  ;;  %v797_v35 = vmul.f32 %v1424_v11, %v534_v27  ;;  %vm663_vm7 = vcmp.ge.f32.partialorder %v535_v28, 0.0  ;;  %v798_v38 = vmul.f32 %v1424_v11, %v535_v28  ;;  %vm664_vm8 = vcmp.ge.f32.partialorder %v536_v29, 0.0 }
  0x6c   : > { %v799_v39 = vmul.f32 %v1424_v11, %v536_v29  ;;  %v924_v40 = vsel %vm661_vm5, %v533_v26, %v796_v34  ;;  %v537_v42 = vadd.f32 %v1406_v1, %v402_v32  ;;  %v538_v43 = vadd.f32 %v1406_v1, %v403_v33 }
  0x6d   : > { %v925_v41 = vsel %vm662_vm6, %v534_v27, %v797_v35  ;;  %1053 = vst.msk [vmem:[%s1449_s14 + $0x200] sm:$0xff] %vm988_vm0, %v924_v40  ;;  %v926_v46 = vsel %vm663_vm7, %v535_v28, %v798_v38  ;;  %v404_v48 = vmul.f32 %v1395_v0, %v269_v36  ;;  %v405_v49 = vmul.f32 %v1395_v0, %v270_v37 }
  0x6e   : > { %1054 = vst.msk [vmem:[%s1449_s14 + $0x208] sm:$0xff] %vm988_vm0, %v925_v41  ;;  %v927_v47 = vsel %vm664_vm8, %v536_v29, %v799_v39  ;;  %1055 = vst.msk [vmem:[%s1449_s14 + $0x210] sm:$0xff] %vm988_vm0, %v926_v46  ;;  %vm665_vm9 = vcmp.ge.f32.partialorder %v537_v42, 0.0  ;;  %v800_v52 = vmul.f32 %v1424_v11, %v537_v42  ;;  %vm666_vm10 = vcmp.ge.f32.partialorder %v538_v43, 0.0  ;;  %v281_v29 = vld [vmem:[%s1401_s8 + $0x290] sm:$0xff]  ;;  %v283_v41 = vld [vmem:[%s1401_s8 + $0x2a0] sm:$0xff] }
  0x6f   : > { %1056 = vst.msk [vmem:[%s1449_s14 + $0x218] sm:$0xff] %vm988_vm0, %v927_v47  ;;  %v801_v53 = vmul.f32 %v1424_v11, %v538_v43  ;;  %v539_v54 = vadd.f32 %v1406_v1, %v404_v48  ;;  %v540_v55 = vadd.f32 %v1406_v1, %v405_v49  ;;  %v406_v56 = vmul.f32 %v1395_v0, %v271_v44 }
  0x70   : > { %v407_v57 = vmul.f32 %v1395_v0, %v272_v45  ;;  %v928_v58 = vsel %vm665_vm9, %v537_v42, %v800_v52  ;;  %v408_v60 = vmul.f32 %v1395_v0, %v273_v50  ;;  %v409_v61 = vmul.f32 %v1395_v0, %v274_v51  ;;  %v284_v42 = vld [vmem:[%s1401_s8 + $0x2a8] sm:$0xff] }
  0x71   : > { %v929_v59 = vsel %vm666_vm10, %v538_v43, %v801_v53  ;;  %1057 = vst.msk [vmem:[%s1449_s14 + $0x220] sm:$0xff] %vm988_vm0, %v928_v58  ;;  %vm667_vm11 = vcmp.ge.f32.partialorder %v539_v54, 0.0  ;;  %v802_v1 = vmul.f32 %v1424_v11, %v539_v54  ;;  %vm668_vm12 = vcmp.ge.f32.partialorder %v540_v55, 0.0 }
  0x72   : > { %1058 = vst.msk [vmem:[%s1449_s14 + $0x228] sm:$0xff] %vm988_vm0, %v929_v59  ;;  %v803_v2 = vmul.f32 %v1424_v11, %v540_v55  ;;  %v541_v0 = vadd.f32 %v1861_v3, %v406_v56  ;;  %v542_v4 = vadd.f32 %v1861_v3, %v407_v57  ;;  %v543_v5 = vadd.f32 %v1861_v3, %v408_v60  ;;  %v1870_v11 = vld [vmem:[%s2255_s1] ss:$0 sm:$0xff]  ;;  %v286_v56 = vld [vmem:[%s1401_s8 + $0x2b8] sm:$0xff] }
  0x73   : > { %v544_v6 = vadd.f32 %v1861_v3, %v409_v61  ;;  %v930_v7 = vsel %vm667_vm11, %v539_v54, %v802_v1  ;;  %v410_v9 = vmul.f32 %v1870_v11, %v275_v62  ;;  %v411_v10 = vmul.f32 %v1870_v11, %v276_v63  ;;  %v287_v63 = vld [vmem:[%s1401_s8 + $0x2c0] sm:$0xff]  ;;  %v288_v1 = vld [vmem:[%s1401_s8 + $0x2c8] sm:$0xff] }
  0x74   : > { %v931_v8 = vsel %vm668_vm12, %v540_v55, %v803_v2  ;;  %1059 = vst.msk [vmem:[%s1449_s14 + $0x230] sm:$0xff] %vm988_vm0, %v930_v7  ;;  %vm669_vm13 = vcmp.ge.f32.partialorder %v541_v0, 0.0  ;;  %v804_v13 = vmul.f32 %v1881_v12, %v541_v0  ;;  %vm670_vm14 = vcmp.ge.f32.partialorder %v542_v4, 0.0  ;;  %v285_v55 = vld [vmem:[%s1401_s8 + $0x2b0] sm:$0xff]  ;;  %v290_v7 = vld [vmem:[%s1401_s8 + $0x2d8] sm:$0xff] }
  0x75   : > { %1060 = vst.msk [vmem:[%s1449_s14 + $0x238] sm:$0xff] %vm988_vm0, %v931_v8  ;;  %v805_v14 = vmul.f32 %v1881_v12, %v542_v4  ;;  %vm671_vm15 = vcmp.ge.f32.partialorder %v543_v5, 0.0  ;;  %v806_v17 = vmul.f32 %v1881_v12, %v543_v5  ;;  %vm672_vm1 = vcmp.ge.f32.partialorder %v544_v6, 0.0 }
  0x76   : > { %v807_v18 = vmul.f32 %v1881_v12, %v544_v6  ;;  %v932_v19 = vsel %vm669_vm13, %v541_v0, %v804_v13  ;;  %v545_v21 = vadd.f32 %v1861_v3, %v410_v9  ;;  %v546_v22 = vadd.f32 %v1861_v3, %v411_v10 }
  0x77   : > { %v933_v20 = vsel %vm670_vm14, %v542_v4, %v805_v14  ;;  %1061 = vst.msk [vmem:[%s1449_s14 + $0x240] sm:$0xff] %vm988_vm0, %v932_v19  ;;  %v934_v25 = vsel %vm671_vm15, %v543_v5, %v806_v17  ;;  %v412_v27 = vmul.f32 %v1870_v11, %v277_v15  ;;  %v413_v28 = vmul.f32 %v1870_v11, %v278_v16 }
  0x78   : > { %1062 = vst.msk [vmem:[%s1449_s14 + $0x248] sm:$0xff] %vm988_vm0, %v933_v20  ;;  %v935_v26 = vsel %vm672_vm1, %v544_v6, %v807_v18  ;;  %1063 = vst.msk [vmem:[%s1449_s14 + $0x250] sm:$0xff] %vm988_vm0, %v934_v25  ;;  %vm673_vm2 = vcmp.ge.f32.partialorder %v545_v21, 0.0  ;;  %v808_v31 = vmul.f32 %v1881_v12, %v545_v21  ;;  %vm674_vm3 = vcmp.ge.f32.partialorder %v546_v22, 0.0  ;;  %v289_v6 = vld [vmem:[%s1401_s8 + $0x2d0] sm:$0xff]  ;;  %v291_v20 = vld [vmem:[%s1401_s8 + $0x2e0] sm:$0xff] }
  0x79   : > { %1064 = vst.msk [vmem:[%s1449_s14 + $0x258] sm:$0xff] %vm988_vm0, %v935_v26  ;;  %v809_v32 = vmul.f32 %v1881_v12, %v546_v22  ;;  %v547_v33 = vadd.f32 %v1861_v3, %v412_v27  ;;  %v548_v34 = vadd.f32 %v1861_v3, %v413_v28  ;;  %v414_v35 = vmul.f32 %v1870_v11, %v279_v23 }
  0x7a   : > { %v415_v36 = vmul.f32 %v1870_v11, %v280_v24  ;;  %v936_v37 = vsel %vm673_vm2, %v545_v21, %v808_v31  ;;  %v416_v39 = vmul.f32 %v1870_v11, %v281_v29  ;;  %v417_v40 = vmul.f32 %v1870_v11, %v282_v30  ;;  %v292_v21 = vld [vmem:[%s1401_s8 + $0x2e8] sm:$0xff] }
  0x7b   : > { %v937_v38 = vsel %vm674_vm3, %v546_v22, %v809_v32  ;;  %1065 = vst.msk [vmem:[%s1449_s14 + $0x260] sm:$0xff] %vm988_vm0, %v936_v37  ;;  %vm675_vm4 = vcmp.ge.f32.partialorder %v547_v33, 0.0  ;;  %v810_v43 = vmul.f32 %v1881_v12, %v547_v33  ;;  %vm676_vm5 = vcmp.ge.f32.partialorder %v548_v34, 0.0 }
  0x7c   : > { %1066 = vst.msk [vmem:[%s1449_s14 + $0x268] sm:$0xff] %vm988_vm0, %v937_v38  ;;  %v811_v44 = vmul.f32 %v1881_v12, %v548_v34  ;;  %v549_v45 = vadd.f32 %v1861_v3, %v414_v35  ;;  %v550_v46 = vadd.f32 %v1861_v3, %v415_v36  ;;  %v551_v47 = vadd.f32 %v1861_v3, %v416_v39  ;;  %v294_v35 = vld [vmem:[%s1401_s8 + $0x2f8] sm:$0xff] }
  0x7d   : > { %v552_v48 = vadd.f32 %v1861_v3, %v417_v40  ;;  %v938_v49 = vsel %vm675_vm4, %v547_v33, %v810_v43  ;;  %v418_v51 = vmul.f32 %v1870_v11, %v283_v41  ;;  %v419_v52 = vmul.f32 %v1870_v11, %v284_v42  ;;  %v295_v42 = vld [vmem:[%s1401_s8 + $0x300] sm:$0xff]  ;;  %v296_v43 = vld [vmem:[%s1401_s8 + $0x308] sm:$0xff] }
  0x7e   : > { %v939_v50 = vsel %vm676_vm5, %v548_v34, %v811_v44  ;;  %1067 = vst.msk [vmem:[%s1449_s14 + $0x270] sm:$0xff] %vm988_vm0, %v938_v49  ;;  %vm677_vm6 = vcmp.ge.f32.partialorder %v549_v45, 0.0  ;;  %v812_v53 = vmul.f32 %v1881_v12, %v549_v45  ;;  %vm678_vm7 = vcmp.ge.f32.partialorder %v550_v46, 0.0  ;;  %v293_v34 = vld [vmem:[%s1401_s8 + $0x2f0] sm:$0xff]  ;;  %v298_v49 = vld [vmem:[%s1401_s8 + $0x318] sm:$0xff] }
  0x7f   : > { %1068 = vst.msk [vmem:[%s1449_s14 + $0x278] sm:$0xff] %vm988_vm0, %v939_v50  ;;  %v813_v54 = vmul.f32 %v1881_v12, %v550_v46  ;;  %vm679_vm8 = vcmp.ge.f32.partialorder %v551_v47, 0.0  ;;  %v814_v57 = vmul.f32 %v1881_v12, %v551_v47  ;;  %vm680_vm9 = vcmp.ge.f32.partialorder %v552_v48, 0.0 }
  0x80   : > { %v815_v58 = vmul.f32 %v1881_v12, %v552_v48  ;;  %v940_v59 = vsel %vm677_vm6, %v549_v45, %v812_v53  ;;  %v553_v61 = vadd.f32 %v1861_v3, %v418_v51  ;;  %v554_v62 = vadd.f32 %v1861_v3, %v419_v52 }
  0x81   : > { %v941_v60 = vsel %vm678_vm7, %v550_v46, %v813_v54  ;;  %1069 = vst.msk [vmem:[%s1449_s14 + $0x280] sm:$0xff] %vm988_vm0, %v940_v59  ;;  %v942_v2 = vsel %vm679_vm8, %v551_v47, %v814_v57  ;;  %v420_v4 = vmul.f32 %v1870_v11, %v285_v55  ;;  %v421_v5 = vmul.f32 %v1870_v11, %v286_v56 }
  0x82   : > { %1070 = vst.msk [vmem:[%s1449_s14 + $0x288] sm:$0xff] %vm988_vm0, %v941_v60  ;;  %v943_v0 = vsel %vm680_vm9, %v552_v48, %v815_v58  ;;  %1071 = vst.msk [vmem:[%s1449_s14 + $0x290] sm:$0xff] %vm988_vm0, %v942_v2  ;;  %vm681_vm10 = vcmp.ge.f32.partialorder %v553_v61, 0.0  ;;  %v816_v8 = vmul.f32 %v1881_v12, %v553_v61  ;;  %vm682_vm11 = vcmp.ge.f32.partialorder %v554_v62, 0.0  ;;  %v297_v48 = vld [vmem:[%s1401_s8 + $0x310] sm:$0xff]  ;;  %v299_v60 = vld [vmem:[%s1401_s8 + $0x320] sm:$0xff] }
  0x83   : > { %1072 = vst.msk [vmem:[%s1449_s14 + $0x298] sm:$0xff] %vm988_vm0, %v943_v0  ;;  %v817_v9 = vmul.f32 %v1881_v12, %v554_v62  ;;  %v555_v10 = vadd.f32 %v1861_v3, %v420_v4  ;;  %v556_v13 = vadd.f32 %v1861_v3, %v421_v5  ;;  %v422_v14 = vmul.f32 %v1870_v11, %v287_v63 }
  0x84   : > { %v423_v15 = vmul.f32 %v1870_v11, %v288_v1  ;;  %v944_v16 = vsel %vm681_vm10, %v553_v61, %v816_v8  ;;  %v424_v18 = vmul.f32 %v1870_v11, %v289_v6  ;;  %v425_v19 = vmul.f32 %v1870_v11, %v290_v7  ;;  %v300_v61 = vld [vmem:[%s1401_s8 + $0x328] sm:$0xff] }
  0x85   : > { %v945_v17 = vsel %vm682_vm11, %v554_v62, %v817_v9  ;;  %1073 = vst.msk [vmem:[%s1449_s14 + $0x2a0] sm:$0xff] %vm988_vm0, %v944_v16  ;;  %vm683_vm12 = vcmp.ge.f32.partialorder %v555_v10, 0.0  ;;  %v818_v22 = vmul.f32 %v1881_v12, %v555_v10  ;;  %vm684_vm13 = vcmp.ge.f32.partialorder %v556_v13, 0.0 }
  0x86   : > { %1074 = vst.msk [vmem:[%s1449_s14 + $0x2a8] sm:$0xff] %vm988_vm0, %v945_v17  ;;  %v819_v23 = vmul.f32 %v1881_v12, %v556_v13  ;;  %v557_v24 = vadd.f32 %v1861_v3, %v422_v14  ;;  %v558_v25 = vadd.f32 %v1861_v3, %v423_v15  ;;  %v559_v26 = vadd.f32 %v1861_v3, %v424_v18  ;;  %v302_v14 = vld [vmem:[%s1401_s8 + $0x338] sm:$0xff] }
  0x87   : > { %v560_v27 = vadd.f32 %v1861_v3, %v425_v19  ;;  %v946_v28 = vsel %vm683_vm12, %v555_v10, %v818_v22  ;;  %v426_v30 = vmul.f32 %v1870_v11, %v291_v20  ;;  %v427_v31 = vmul.f32 %v1870_v11, %v292_v21  ;;  %v303_v21 = vld [vmem:[%s1401_s8 + $0x340] sm:$0xff]  ;;  %v304_v22 = vld [vmem:[%s1401_s8 + $0x348] sm:$0xff] }
  0x88   : > { %v947_v29 = vsel %vm684_vm13, %v556_v13, %v819_v23  ;;  %1075 = vst.msk [vmem:[%s1449_s14 + $0x2b0] sm:$0xff] %vm988_vm0, %v946_v28  ;;  %vm685_vm14 = vcmp.ge.f32.partialorder %v557_v24, 0.0  ;;  %v820_v32 = vmul.f32 %v1881_v12, %v557_v24  ;;  %vm686_vm15 = vcmp.ge.f32.partialorder %v558_v25, 0.0  ;;  %v301_v13 = vld [vmem:[%s1401_s8 + $0x330] sm:$0xff]  ;;  %v306_v28 = vld [vmem:[%s1401_s8 + $0x358] sm:$0xff] }
  0x89   : > { %1076 = vst.msk [vmem:[%s1449_s14 + $0x2b8] sm:$0xff] %vm988_vm0, %v947_v29  ;;  %v821_v33 = vmul.f32 %v1881_v12, %v558_v25  ;;  %vm687_vm1 = vcmp.ge.f32.partialorder %v559_v26, 0.0  ;;  %v822_v36 = vmul.f32 %v1881_v12, %v559_v26  ;;  %vm688_vm2 = vcmp.ge.f32.partialorder %v560_v27, 0.0 }
  0x8a   : > { %v823_v37 = vmul.f32 %v1881_v12, %v560_v27  ;;  %v948_v38 = vsel %vm685_vm14, %v557_v24, %v820_v32  ;;  %v561_v40 = vadd.f32 %v1861_v3, %v426_v30  ;;  %v562_v41 = vadd.f32 %v1861_v3, %v427_v31 }
  0x8b   : > { %v949_v39 = vsel %vm686_vm15, %v558_v25, %v821_v33  ;;  %1077 = vst.msk [vmem:[%s1449_s14 + $0x2c0] sm:$0xff] %vm988_vm0, %v948_v38  ;;  %v950_v44 = vsel %vm687_vm1, %v559_v26, %v822_v36  ;;  %v428_v46 = vmul.f32 %v1870_v11, %v293_v34  ;;  %v429_v47 = vmul.f32 %v1870_v11, %v294_v35 }
  0x8c   : > { %1078 = vst.msk [vmem:[%s1449_s14 + $0x2c8] sm:$0xff] %vm988_vm0, %v949_v39  ;;  %v951_v45 = vsel %vm688_vm2, %v560_v27, %v823_v37  ;;  %1079 = vst.msk [vmem:[%s1449_s14 + $0x2d0] sm:$0xff] %vm988_vm0, %v950_v44  ;;  %vm689_vm3 = vcmp.ge.f32.partialorder %v561_v40, 0.0  ;;  %v824_v50 = vmul.f32 %v1881_v12, %v561_v40  ;;  %vm690_vm4 = vcmp.ge.f32.partialorder %v562_v41, 0.0  ;;  %v305_v27 = vld [vmem:[%s1401_s8 + $0x350] sm:$0xff]  ;;  %v307_v39 = vld [vmem:[%s1401_s8 + $0x360] sm:$0xff] }
  0x8d   : > { %1080 = vst.msk [vmem:[%s1449_s14 + $0x2d8] sm:$0xff] %vm988_vm0, %v951_v45  ;;  %v825_v51 = vmul.f32 %v1881_v12, %v562_v41  ;;  %v563_v52 = vadd.f32 %v1861_v3, %v428_v46  ;;  %v564_v53 = vadd.f32 %v1861_v3, %v429_v47  ;;  %v430_v54 = vmul.f32 %v1870_v11, %v295_v42 }
  0x8e   : > { %v431_v55 = vmul.f32 %v1870_v11, %v296_v43  ;;  %v952_v56 = vsel %vm689_vm3, %v561_v40, %v824_v50  ;;  %v432_v58 = vmul.f32 %v1870_v11, %v297_v48  ;;  %v433_v59 = vmul.f32 %v1870_v11, %v298_v49  ;;  %v308_v40 = vld [vmem:[%s1401_s8 + $0x368] sm:$0xff] }
  0x8f   : > { %v953_v57 = vsel %vm690_vm4, %v562_v41, %v825_v51  ;;  %1081 = vst.msk [vmem:[%s1449_s14 + $0x2e0] sm:$0xff] %vm988_vm0, %v952_v56  ;;  %vm691_vm5 = vcmp.ge.f32.partialorder %v563_v52, 0.0  ;;  %v826_v62 = vmul.f32 %v1881_v12, %v563_v52  ;;  %vm692_vm6 = vcmp.ge.f32.partialorder %v564_v53, 0.0 }
  0x90   : > { %1082 = vst.msk [vmem:[%s1449_s14 + $0x2e8] sm:$0xff] %vm988_vm0, %v953_v57  ;;  %v827_v63 = vmul.f32 %v1881_v12, %v564_v53  ;;  %v565_v1 = vadd.f32 %v1861_v3, %v430_v54  ;;  %v566_v2 = vadd.f32 %v1861_v3, %v431_v55  ;;  %v567_v0 = vadd.f32 %v1861_v3, %v432_v58  ;;  %v310_v54 = vld [vmem:[%s1401_s8 + $0x378] sm:$0xff] }
  0x91   : > { %v568_v4 = vadd.f32 %v1861_v3, %v433_v59  ;;  %v954_v5 = vsel %vm691_vm5, %v563_v52, %v826_v62  ;;  %v434_v7 = vmul.f32 %v1870_v11, %v299_v60  ;;  %v435_v8 = vmul.f32 %v1870_v11, %v300_v61  ;;  %v311_v61 = vld [vmem:[%s1401_s8 + $0x380] sm:$0xff]  ;;  %v312_v62 = vld [vmem:[%s1401_s8 + $0x388] sm:$0xff] }
  0x92   : > { %v955_v6 = vsel %vm692_vm6, %v564_v53, %v827_v63  ;;  %1083 = vst.msk [vmem:[%s1449_s14 + $0x2f0] sm:$0xff] %vm988_vm0, %v954_v5  ;;  %vm693_vm7 = vcmp.ge.f32.partialorder %v565_v1, 0.0  ;;  %v828_v9 = vmul.f32 %v1881_v12, %v565_v1  ;;  %vm694_vm8 = vcmp.ge.f32.partialorder %v566_v2, 0.0  ;;  %v309_v53 = vld [vmem:[%s1401_s8 + $0x370] sm:$0xff]  ;;  %v314_v5 = vld [vmem:[%s1401_s8 + $0x398] sm:$0xff] }
  0x93   : > { %1084 = vst.msk [vmem:[%s1449_s14 + $0x2f8] sm:$0xff] %vm988_vm0, %v955_v6  ;;  %v829_v10 = vmul.f32 %v1881_v12, %v566_v2  ;;  %vm695_vm9 = vcmp.ge.f32.partialorder %v567_v0, 0.0  ;;  %v830_v15 = vmul.f32 %v1881_v12, %v567_v0  ;;  %vm696_vm10 = vcmp.ge.f32.partialorder %v568_v4, 0.0 }
  0x94   : > { %v831_v16 = vmul.f32 %v1881_v12, %v568_v4  ;;  %v956_v17 = vsel %vm693_vm7, %v565_v1, %v828_v9  ;;  %v569_v19 = vadd.f32 %v1861_v3, %v434_v7  ;;  %v570_v20 = vadd.f32 %v1861_v3, %v435_v8 }
  0x95   : > { %v957_v18 = vsel %vm694_vm8, %v566_v2, %v829_v10  ;;  %1085 = vst.msk [vmem:[%s1449_s14 + $0x300] sm:$0xff] %vm988_vm0, %v956_v17  ;;  %v958_v23 = vsel %vm695_vm9, %v567_v0, %v830_v15  ;;  %v436_v25 = vmul.f32 %v1870_v11, %v301_v13  ;;  %v437_v26 = vmul.f32 %v1870_v11, %v302_v14 }
  0x96   : > { %1086 = vst.msk [vmem:[%s1449_s14 + $0x308] sm:$0xff] %vm988_vm0, %v957_v18  ;;  %v959_v24 = vsel %vm696_vm10, %v568_v4, %v831_v16  ;;  %1087 = vst.msk [vmem:[%s1449_s14 + $0x310] sm:$0xff] %vm988_vm0, %v958_v23  ;;  %vm697_vm11 = vcmp.ge.f32.partialorder %v569_v19, 0.0  ;;  %v832_v29 = vmul.f32 %v1881_v12, %v569_v19  ;;  %vm698_vm12 = vcmp.ge.f32.partialorder %v570_v20, 0.0  ;;  %v313_v4 = vld [vmem:[%s1401_s8 + $0x390] sm:$0xff]  ;;  %v315_v18 = vld [vmem:[%s1401_s8 + $0x3a0] sm:$0xff] }
  0x97   : > { %1088 = vst.msk [vmem:[%s1449_s14 + $0x318] sm:$0xff] %vm988_vm0, %v959_v24  ;;  %v833_v30 = vmul.f32 %v1881_v12, %v570_v20  ;;  %v571_v31 = vadd.f32 %v1861_v3, %v436_v25  ;;  %v572_v32 = vadd.f32 %v1861_v3, %v437_v26  ;;  %v438_v33 = vmul.f32 %v1870_v11, %v303_v21 }
  0x98   : > { %v439_v34 = vmul.f32 %v1870_v11, %v304_v22  ;;  %v960_v35 = vsel %vm697_vm11, %v569_v19, %v832_v29  ;;  %v440_v37 = vmul.f32 %v1870_v11, %v305_v27  ;;  %v441_v38 = vmul.f32 %v1870_v11, %v306_v28  ;;  %v316_v19 = vld [vmem:[%s1401_s8 + $0x3a8] sm:$0xff] }
  0x99   : > { %v961_v36 = vsel %vm698_vm12, %v570_v20, %v833_v30  ;;  %1089 = vst.msk [vmem:[%s1449_s14 + $0x320] sm:$0xff] %vm988_vm0, %v960_v35  ;;  %vm699_vm13 = vcmp.ge.f32.partialorder %v571_v31, 0.0  ;;  %v834_v41 = vmul.f32 %v1881_v12, %v571_v31  ;;  %vm700_vm14 = vcmp.ge.f32.partialorder %v572_v32, 0.0 }
  0x9a   : > { %1090 = vst.msk [vmem:[%s1449_s14 + $0x328] sm:$0xff] %vm988_vm0, %v961_v36  ;;  %v835_v42 = vmul.f32 %v1881_v12, %v572_v32  ;;  %v573_v43 = vadd.f32 %v1861_v3, %v438_v33  ;;  %v574_v44 = vadd.f32 %v1861_v3, %v439_v34  ;;  %v575_v45 = vadd.f32 %v1861_v3, %v440_v37  ;;  %v318_v33 = vld [vmem:[%s1401_s8 + $0x3b8] sm:$0xff] }
  0x9b   : > { %v576_v46 = vadd.f32 %v1861_v3, %v441_v38  ;;  %v962_v47 = vsel %vm699_vm13, %v571_v31, %v834_v41  ;;  %v442_v49 = vmul.f32 %v1870_v11, %v307_v39  ;;  %v443_v50 = vmul.f32 %v1870_v11, %v308_v40  ;;  %v319_v40 = vld [vmem:[%s1401_s8 + $0x3c0] sm:$0xff]  ;;  %v320_v41 = vld [vmem:[%s1401_s8 + $0x3c8] sm:$0xff] }
  0x9c   : > { %v963_v48 = vsel %vm700_vm14, %v572_v32, %v835_v42  ;;  %1091 = vst.msk [vmem:[%s1449_s14 + $0x330] sm:$0xff] %vm988_vm0, %v962_v47  ;;  %vm701_vm15 = vcmp.ge.f32.partialorder %v573_v43, 0.0  ;;  %v836_v51 = vmul.f32 %v1881_v12, %v573_v43  ;;  %vm702_vm1 = vcmp.ge.f32.partialorder %v574_v44, 0.0  ;;  %v317_v32 = vld [vmem:[%s1401_s8 + $0x3b0] sm:$0xff]  ;;  %v322_v47 = vld [vmem:[%s1401_s8 + $0x3d8] sm:$0xff] }
  0x9d   : > { %1092 = vst.msk [vmem:[%s1449_s14 + $0x338] sm:$0xff] %vm988_vm0, %v963_v48  ;;  %v837_v52 = vmul.f32 %v1881_v12, %v574_v44  ;;  %vm703_vm2 = vcmp.ge.f32.partialorder %v575_v45, 0.0  ;;  %v838_v55 = vmul.f32 %v1881_v12, %v575_v45  ;;  %vm704_vm3 = vcmp.ge.f32.partialorder %v576_v46, 0.0 }
  0x9e   : > { %v839_v56 = vmul.f32 %v1881_v12, %v576_v46  ;;  %v964_v57 = vsel %vm701_vm15, %v573_v43, %v836_v51  ;;  %v577_v59 = vadd.f32 %v1861_v3, %v442_v49  ;;  %v578_v60 = vadd.f32 %v1861_v3, %v443_v50 }
  0x9f   : > { %v965_v58 = vsel %vm702_vm1, %v574_v44, %v837_v52  ;;  %1093 = vst.msk [vmem:[%s1449_s14 + $0x340] sm:$0xff] %vm988_vm0, %v964_v57  ;;  %v966_v63 = vsel %vm703_vm2, %v575_v45, %v838_v55  ;;  %v444_v2 = vmul.f32 %v1870_v11, %v309_v53  ;;  %v445_v0 = vmul.f32 %v1870_v11, %v310_v54 }
  0xa0   : > { %1094 = vst.msk [vmem:[%s1449_s14 + $0x348] sm:$0xff] %vm988_vm0, %v965_v58  ;;  %v967_v1 = vsel %vm704_vm3, %v576_v46, %v839_v56  ;;  %1095 = vst.msk [vmem:[%s1449_s14 + $0x350] sm:$0xff] %vm988_vm0, %v966_v63  ;;  %vm705_vm4 = vcmp.ge.f32.partialorder %v577_v59, 0.0  ;;  %v840_v6 = vmul.f32 %v1881_v12, %v577_v59  ;;  %vm706_vm5 = vcmp.ge.f32.partialorder %v578_v60, 0.0  ;;  %v321_v46 = vld [vmem:[%s1401_s8 + $0x3d0] sm:$0xff]  ;;  %v323_v58 = vld [vmem:[%s1401_s8 + $0x3e0] sm:$0xff] }
  0xa1   : > { %1096 = vst.msk [vmem:[%s1449_s14 + $0x358] sm:$0xff] %vm988_vm0, %v967_v1  ;;  %v841_v7 = vmul.f32 %v1881_v12, %v578_v60  ;;  %v579_v8 = vadd.f32 %v1861_v3, %v444_v2  ;;  %v580_v9 = vadd.f32 %v1861_v3, %v445_v0  ;;  %v446_v10 = vmul.f32 %v1870_v11, %v311_v61 }
  0xa2   : > { %v447_v13 = vmul.f32 %v1870_v11, %v312_v62  ;;  %v968_v14 = vsel %vm705_vm4, %v577_v59, %v840_v6  ;;  %v448_v16 = vmul.f32 %v1870_v11, %v313_v4  ;;  %v449_v17 = vmul.f32 %v1870_v11, %v314_v5  ;;  %v324_v59 = vld [vmem:[%s1401_s8 + $0x3e8] sm:$0xff] }
  0xa3   : > { %v969_v15 = vsel %vm706_vm5, %v578_v60, %v841_v7  ;;  %1097 = vst.msk [vmem:[%s1449_s14 + $0x360] sm:$0xff] %vm988_vm0, %v968_v14  ;;  %vm707_vm6 = vcmp.ge.f32.partialorder %v579_v8, 0.0  ;;  %v842_v20 = vmul.f32 %v1881_v12, %v579_v8  ;;  %vm708_vm7 = vcmp.ge.f32.partialorder %v580_v9, 0.0 }
  0xa4   : > { %1098 = vst.msk [vmem:[%s1449_s14 + $0x368] sm:$0xff] %vm988_vm0, %v969_v15  ;;  %v843_v21 = vmul.f32 %v1881_v12, %v580_v9  ;;  %v581_v22 = vadd.f32 %v1861_v3, %v446_v10  ;;  %v582_v23 = vadd.f32 %v1861_v3, %v447_v13  ;;  %v583_v24 = vadd.f32 %v1861_v3, %v448_v16  ;;  %v326_v10 = vld [vmem:[%s1401_s8 + $0x3f8] sm:$0xff] }
  0xa5   : > { %v584_v25 = vadd.f32 %v1861_v3, %v449_v17  ;;  %v970_v26 = vsel %vm707_vm6, %v579_v8, %v842_v20  ;;  %v450_v28 = vmul.f32 %v1870_v11, %v315_v18  ;;  %v451_v29 = vmul.f32 %v1870_v11, %v316_v19 }
  0xa6   : > { %v971_v27 = vsel %vm708_vm7, %v580_v9, %v843_v21  ;;  %1099 = vst.msk [vmem:[%s1449_s14 + $0x370] sm:$0xff] %vm988_vm0, %v970_v26  ;;  %vm709_vm8 = vcmp.ge.f32.partialorder %v581_v22, 0.0  ;;  %v844_v30 = vmul.f32 %v1881_v12, %v581_v22  ;;  %vm710_vm9 = vcmp.ge.f32.partialorder %v582_v23, 0.0  ;;  %v325_v9 = vld [vmem:[%s1401_s8 + $0x3f0] sm:$0xff]  ;;  %s2204_s8 = scalar_lea.hbm %s2258_s4, %s1208_s30 }
  0xa7   : > { %1100 = vst.msk [vmem:[%s1449_s14 + $0x378] sm:$0xff] %vm988_vm0, %v971_v27  ;;  %v845_v31 = vmul.f32 %v1881_v12, %v582_v23  ;;  %vm711_vm10 = vcmp.ge.f32.partialorder %v583_v24, 0.0  ;;  %v846_v34 = vmul.f32 %v1881_v12, %v583_v24  ;;  %vm712_vm11 = vcmp.ge.f32.partialorder %v584_v25, 0.0 }
  0xa8   : > { %v847_v35 = vmul.f32 %v1881_v12, %v584_v25  ;;  %v972_v36 = vsel %vm709_vm8, %v581_v22, %v844_v30  ;;  %v585_v38 = vadd.f32 %v1861_v3, %v450_v28  ;;  %v586_v39 = vadd.f32 %v1861_v3, %v451_v29 }
  0xa9   : > { %v973_v37 = vsel %vm710_vm9, %v582_v23, %v845_v31  ;;  %1101 = vst.msk [vmem:[%s1449_s14 + $0x380] sm:$0xff] %vm988_vm0, %v972_v36  ;;  %v974_v42 = vsel %vm711_vm10, %v583_v24, %v846_v34  ;;  %v452_v44 = vmul.f32 %v1870_v11, %v317_v32  ;;  %v453_v45 = vmul.f32 %v1870_v11, %v318_v33 }
  0xaa   : > { %1102 = vst.msk [vmem:[%s1449_s14 + $0x388] sm:$0xff] %vm988_vm0, %v973_v37  ;;  %v975_v43 = vsel %vm712_vm11, %v584_v25, %v847_v35  ;;  %1103 = vst.msk [vmem:[%s1449_s14 + $0x390] sm:$0xff] %vm988_vm0, %v974_v42  ;;  %vm713_vm12 = vcmp.ge.f32.partialorder %v585_v38, 0.0  ;;  %v848_v48 = vmul.f32 %v1881_v12, %v585_v38  ;;  %vm714_vm13 = vcmp.ge.f32.partialorder %v586_v39, 0.0 }
  0xab   : > { %1104 = vst.msk [vmem:[%s1449_s14 + $0x398] sm:$0xff] %vm988_vm0, %v975_v43  ;;  %v849_v49 = vmul.f32 %v1881_v12, %v586_v39  ;;  %v587_v50 = vadd.f32 %v1861_v3, %v452_v44  ;;  %v588_v51 = vadd.f32 %v1861_v3, %v453_v45  ;;  %v454_v52 = vmul.f32 %v1870_v11, %v319_v40 }
  0xac   : > { %v455_v53 = vmul.f32 %v1870_v11, %v320_v41  ;;  %v976_v54 = vsel %vm713_vm12, %v585_v38, %v848_v48  ;;  %v456_v56 = vmul.f32 %v1870_v11, %v321_v46  ;;  %v457_v57 = vmul.f32 %v1870_v11, %v322_v47 }
  0xad   : > { %v977_v55 = vsel %vm714_vm13, %v586_v39, %v849_v49  ;;  %1105 = vst.msk [vmem:[%s1449_s14 + $0x3a0] sm:$0xff] %vm988_vm0, %v976_v54  ;;  %vm715_vm14 = vcmp.ge.f32.partialorder %v587_v50, 0.0  ;;  %v850_v60 = vmul.f32 %v1881_v12, %v587_v50  ;;  %vm716_vm15 = vcmp.ge.f32.partialorder %v588_v51, 0.0 }
  0xae   : > { %1106 = vst.msk [vmem:[%s1449_s14 + $0x3a8] sm:$0xff] %vm988_vm0, %v977_v55  ;;  %v851_v61 = vmul.f32 %v1881_v12, %v588_v51  ;;  %v589_v62 = vadd.f32 %v1861_v3, %v454_v52  ;;  %v590_v63 = vadd.f32 %v1861_v3, %v455_v53  ;;  %v591_v1 = vadd.f32 %v1861_v3, %v456_v56 }
  0xaf   : > { %v592_v2 = vadd.f32 %v1861_v3, %v457_v57  ;;  %v978_v0 = vsel %vm715_vm14, %v587_v50, %v850_v60  ;;  %v458_v5 = vmul.f32 %v1870_v11, %v323_v58  ;;  %v459_v6 = vmul.f32 %v1870_v11, %v324_v59 }
  0xb0   : > { %v979_v4 = vsel %vm716_vm15, %v588_v51, %v851_v61  ;;  %1107 = vst.msk [vmem:[%s1449_s14 + $0x3b0] sm:$0xff] %vm988_vm0, %v978_v0  ;;  %vm717_vm1 = vcmp.ge.f32.partialorder %v589_v62, 0.0  ;;  %v852_v7 = vmul.f32 %v1881_v12, %v589_v62  ;;  %vm718_vm2 = vcmp.ge.f32.partialorder %v590_v63, 0.0 }
  0xb1   : > { %1108 = vst.msk [vmem:[%s1449_s14 + $0x3b8] sm:$0xff] %vm988_vm0, %v979_v4  ;;  %v853_v8 = vmul.f32 %v1881_v12, %v590_v63  ;;  %vm719_vm3 = vcmp.ge.f32.partialorder %v591_v1, 0.0  ;;  %v854_v13 = vmul.f32 %v1881_v12, %v591_v1  ;;  %vm720_vm4 = vcmp.ge.f32.partialorder %v592_v2, 0.0 }
  0xb2   : > { %v855_v14 = vmul.f32 %v1881_v12, %v592_v2  ;;  %v980_v15 = vsel %vm717_vm1, %v589_v62, %v852_v7  ;;  %v593_v17 = vadd.f32 %v1861_v3, %v458_v5  ;;  %v594_v18 = vadd.f32 %v1861_v3, %v459_v6 }
  0xb3   : > { %v981_v16 = vsel %vm718_vm2, %v590_v63, %v853_v8  ;;  %1109 = vst.msk [vmem:[%s1449_s14 + $0x3c0] sm:$0xff] %vm988_vm0, %v980_v15  ;;  %v982_v19 = vsel %vm719_vm3, %v591_v1, %v854_v13  ;;  %v460_v21 = vmul.f32 %v1870_v11, %v325_v9  ;;  %v461_v22 = vmul.f32 %v1870_v11, %v326_v10 }
  0xb4   : > { %1110 = vst.msk [vmem:[%s1449_s14 + $0x3c8] sm:$0xff] %vm988_vm0, %v981_v16  ;;  %v983_v20 = vsel %vm720_vm4, %v592_v2, %v855_v14  ;;  %1111 = vst.msk [vmem:[%s1449_s14 + $0x3d0] sm:$0xff] %vm988_vm0, %v982_v19  ;;  %vm721_vm5 = vcmp.ge.f32.partialorder %v593_v17, 0.0  ;;  %v856_v23 = vmul.f32 %v1881_v12, %v593_v17  ;;  %vm722_vm6 = vcmp.ge.f32.partialorder %v594_v18, 0.0 }
  0xb5   : > { %1112 = vst.msk [vmem:[%s1449_s14 + $0x3d8] sm:$0xff] %vm988_vm0, %v983_v20  ;;  %v857_v24 = vmul.f32 %v1881_v12, %v594_v18  ;;  %v595_v25 = vadd.f32 %v1861_v3, %v460_v21  ;;  %v596_v26 = vadd.f32 %v1861_v3, %v461_v22 }
  0xb6   : > { %v984_v11 = vsel %vm721_vm5, %v593_v17, %v856_v23 }
  0xb7   : > { %v985_v27 = vsel %vm722_vm6, %v594_v18, %v857_v24  ;;  %1113 = vst.msk [vmem:[%s1449_s14 + $0x3e0] sm:$0xff] %vm988_vm0, %v984_v11  ;;  %vm723_vm7 = vcmp.ge.f32.partialorder %v595_v25, 0.0  ;;  %v858_v28 = vmul.f32 %v1881_v12, %v595_v25  ;;  %vm724_vm8 = vcmp.ge.f32.partialorder %v596_v26, 0.0 }
  0xb8   : > { %1114 = vst.msk [vmem:[%s1449_s14 + $0x3e8] sm:$0xff] %vm988_vm0, %v985_v27  ;;  %v859_v29 = vmul.f32 %v1881_v12, %v596_v26 }
  0xb9   : > { %v986_v3 = vsel %vm723_vm7, %v595_v25, %v858_v28 }
  0xba   : > { %v987_v30 = vsel %vm724_vm8, %v596_v26, %v859_v29  ;;  %1115 = vst.msk [vmem:[%s1449_s14 + $0x3f0] sm:$0xff] %vm988_vm0, %v986_v3 }
  0xbb   : > { %1116 = vst.msk [vmem:[%s1449_s14 + $0x3f8] sm:$0xff] %vm988_vm0, %v987_v30 }
  0xbc   : > { %1266 = shalt.err (!%p1263_p3)
}
  0xbd   : > { %s1267_s5 = scalar_lea.hbm %s2204_s8, 16384  ;;  %s1271_s22 = scalar_lea.hbm %s2258_s4, 32768 }
  0xbe   : > { %p1268_p4 = scmp.ne.s32.totalorder %s2204_s8, %s1267_s5  ;;  %p1272_p9 = scmp.lt.s32.totalorder %s2204_s8, %s2258_s4 }
  0xbf   : > { %p1273_p10 = scmp.lt.s32.totalorder %s1271_s22, %s1267_s5 }
  0xc0   : > { %p1269_p7 = pnand %p1268_p4, %p1381_p5 }
  0xc1   : > { %p1274_p11 = por %p1273_p10, %p1272_p9 }
  0xc2   : > { %p1270_p8 = pneg %p1269_p7 }
  0xc4   : > { %p1275_p12 = pnand %p1274_p11, %p1270_p8 }
  0xc6   : > { %1278 = shalt.err (!%p1275_p12)
}
  0xc7   : > { %s1316_s28 = smov 128   ;;  %s1317_s29 = smov 8  }
  0xc8   : > { %1209 = dma.vmem_to_hbm [thread:$0]  (%p1381_p5), %s2206_s6, 16384, %s2204_s8, %s2214_s9, %s1316_s28, %s1316_s28, %s1317_s29  }
  0xc9 PF: > { %p1215_p13 = scmp.ge.s32.totalorder %s1313_s18, 2  ;;  %s1146_s30 = sand.u32 1, %s1301_s15  }
  0xca   : > { %s1147_s19 = scalar_lea.sflag [#allocation3], %s1146_s30 }
  0xcb   : > { %p1212_p0 = pnand %p1215_p13, %p1385_p6 }
  0xcd   : > { %p1213_p1 = pneg %p1212_p0 }
  0xcf   : > { %1296 = dma.done.wait (%p1213_p1), %s1147_s19, 16384  }
  0xd0   : > { %1298 = vsyncadd (%p1213_p1), %s1147_s19, 4294950912  ;;  %p14_p2 = scmp.ge.s32.totalorder %s1368_s21, 4   ;;  %s2261_s15 = smov %s1305_s16 }
  0xd1   : > { %s2262_s16 = smov %s1309_s17  ;;  %s2263_s17 = smov %s1379_s24 }
  0xd2   : > { %s2264_s18 = smov %s1368_s21  ;;  %16 = sbr.rel (!%p14_p2) target bundleno = 3 (0x3), region = 71 }
  0xd7   :  { %1152 = vsyncpa [#allocation3], 1 }
  0xd8   :  { %1154 = vsyncpa [#allocation3 + $0x1], 1 }

</bundles_post_ra>
